<compile_context>
chip_gen: v7x
topology: tpu7x:2x2x1
jax: 0.10.0
libtpu: 0.0.40
codegen_flags: <defaults>
</compile_context>

<pallas_src>
import functools

import jax
import jax.numpy as jnp
from jax import lax
from jax.experimental import pallas as pl
from jax.experimental.pallas import tpu as pltpu

OBSERVATIONS_DIM = 4
HIDDEN_DIM = 16
ACTIONS_DIM = 2

_LANE = 128                 # TPU lane width (last dim of a vreg)
_SUB = 8                    # f32 sublanes (second-to-last dim of a vreg)
_CHUNK = _SUB * _LANE       # 1024 batch elements per (8,128) sub-chunk
_TC_MAX = 8                 # sub-chunks per grid block -> 8192 batch / block


def _cdiv(a, b):
    return -(-a // b)


def _linear(w_ref, b_ref, h):
    """acc[o, s, l] = b[o] + sum_k w[k, o] * h[k, s, l].

    w_ref: (K, O, 8, 128) weight columns pre-broadcast over the (8,128) batch
    sub-chunk (VMEM-resident); b_ref: (O, 8, 128); h: (K, 8, 128).
    Every term is a VMEM vld + VPU mul + add, lane- and sublane-dense; no
    broadcasts are re-materialized inside the loop.
    """
    acc = b_ref[...] + w_ref[0] * h[0]
    for k in range(1, w_ref.shape[0]):
        acc = acc + w_ref[k] * h[k]
    return acc


def _mlp_kernel(x_ref, w1_ref, b1_ref, w2_ref, b2_ref, w3_ref, b3_ref, o_ref):
    """x_ref: (TC, 4, 8, 128) -> o_ref: (TC, 2, 8, 128)."""
    tc = x_ref.shape[0]
    # Unrolled loop over (8,128) batch sub-chunks; each sub-chunk's h1/h2
    # (16 vregs each) die at its store, keeping live state well under 64 vregs.
    for c in range(tc):
        x = x_ref[c]                                               # (4, 8, 128)
        h1 = jnp.maximum(_linear(w1_ref, b1_ref, x), 0.0)          # (16, 8, 128)
        h2 = jnp.maximum(_linear(w2_ref, b2_ref, h1), 0.0)         # (16, 8, 128)
        o_ref[c] = _linear(w3_ref, b3_ref, h2).astype(o_ref.dtype)  # (2, 8, 128)


def pack_params(params):
    """Pre-broadcast every weight column / bias over an (8,128) batch sub-chunk.

    Call ONCE per set of parameters (it is params-only); the packed buffers
    (~1.5 MiB f32 total) stay resident in VMEM across the whole grid.
    Weights come in as (in, out) (reference math is x @ W + b).
    """
    w1, b1, w2, b2, w3, b3 = params

    def wpack(w):                       # (K, O) -> (K, O, 8, 128)
        w = w.astype(jnp.float32)
        return jnp.broadcast_to(w[:, :, None, None], (*w.shape, _SUB, _LANE))

    def bpack(b):                       # (1, O) / (O,) -> (O, 8, 128)
        b = b.reshape(-1).astype(jnp.float32)
        return jnp.broadcast_to(b[:, None, None], (b.shape[0], _SUB, _LANE))

    return (wpack(w1), bpack(b1), wpack(w2), bpack(b2), wpack(w3), bpack(b3))


def _forward_kernel(x, packed):
    b = x.shape[0]
    nchunk = max(1, _cdiv(b, _CHUNK))
    if nchunk >= 2 * _TC_MAX:
        tc = _TC_MAX                       # full 8192-element blocks
    else:
        tc = max(1, _cdiv(nchunk, 2))      # keep >= 2 grid steps when possible
    nchunk_p = _cdiv(nchunk, tc) * tc
    bp = nchunk_p * _CHUNK

    # Batch-dense layout: batch lives on both sublanes and lanes. Single fused
    # pad + transpose pass under jit; tail entries are zero and sliced off.
    x_pad = jnp.zeros((bp, OBSERVATIONS_DIM), jnp.float32).at[:b].set(
        x.astype(jnp.float32))
    x_pack = x_pad.reshape(nchunk_p, _SUB, _LANE, OBSERVATIONS_DIM)
    x_pack = x_pack.transpose(0, 3, 1, 2)            # (nchunk_p, 4, 8, 128)

    wb1, bb1, wb2, bb2, wb3, bb3 = packed
    const4 = lambda i: (0, 0, 0, 0)
    const3 = lambda i: (0, 0, 0)

    out_pack = pl.pallas_call(
        _mlp_kernel,
        out_shape=jax.ShapeDtypeStruct(
            (nchunk_p, ACTIONS_DIM, _SUB, _LANE), jnp.float32),
        grid=(nchunk_p // tc,),
        in_specs=[
            pl.BlockSpec((tc, OBSERVATIONS_DIM, _SUB, _LANE),
                         lambda i: (i, 0, 0, 0)),
            pl.BlockSpec(wb1.shape, const4),   # resident params: DMA'd once
            pl.BlockSpec(bb1.shape, const3),
            pl.BlockSpec(wb2.shape, const4),
            pl.BlockSpec(bb2.shape, const3),
            pl.BlockSpec(wb3.shape, const4),
            pl.BlockSpec(bb3.shape, const3),
        ],
        out_specs=pl.BlockSpec((tc, ACTIONS_DIM, _SUB, _LANE),
                               lambda i: (i, 0, 0, 0)),
        compiler_params=pltpu.CompilerParams(
            dimension_semantics=("parallel",)),
    )(x_pack, wb1, bb1, wb2, bb2, wb3, bb3)

    out = out_pack.transpose(0, 2, 3, 1).reshape(bp, ACTIONS_DIM)
    return out[:b]


def _forward_dense(x, packed):
    """Small-batch fast path: plain fused-XLA dot chain (no kernel dispatch)."""
    wb1, bb1, wb2, bb2, wb3, bb3 = packed
    w1, b1 = wb1[:, :, 0, 0], bb1[:, 0, 0]
    w2, b2 = wb2[:, :, 0, 0], bb2[:, 0, 0]
    w3, b3 = wb3[:, :, 0, 0], bb3[:, 0, 0]
    hp = lax.Precision.HIGHEST
    h1 = jnp.maximum(jnp.dot(x, w1, precision=hp) + b1, 0.0)
    h2 = jnp.maximum(jnp.dot(h1, w2, precision=hp) + b2, 0.0)
    return jnp.dot(h2, w3, precision=hp) + b3


@functools.partial(jax.jit, static_argnames=("min_kernel_batch",))
def net_forward(x, packed, min_kernel_batch=512):
    """x: (B, OBSERVATIONS_DIM) -> (B, ACTIONS_DIM), float32."""
    if x.shape[0] < min_kernel_batch:
        return _forward_dense(x.astype(jnp.float32), packed)
    return _forward_kernel(x, packed)


def init_params(key):
    """PyTorch-Linear-style init (U[-1/sqrt(fan_in), +1/sqrt(fan_in)]).

    Weights stored as (in, out); biases as (1, out).
    """
    ks = jax.random.split(key, 6)

    def linear(kw, kb, fan_in, fan_out):
        bound = 1.0 / jnp.sqrt(jnp.float32(fan_in))
        w = jax.random.uniform(kw, (fan_in, fan_out), jnp.float32, -bound, bound)
        b = jax.random.uniform(kb, (1, fan_out), jnp.float32, -bound, bound)
        return w, b

    w1, b1 = linear(ks[0], ks[1], OBSERVATIONS_DIM, HIDDEN_DIM)
    w2, b2 = linear(ks[2], ks[3], HIDDEN_DIM, HIDDEN_DIM)
    w3, b3 = linear(ks[4], ks[5], HIDDEN_DIM, ACTIONS_DIM)
    return (w1, b1, w2, b2, w3, b3)


def reference_forward(x, params):
    """Plain-JAX reference for correctness checking (full f32 precision)."""
    w1, b1, w2, b2, w3, b3 = params
    hp = lax.Precision.HIGHEST
    h1 = jnp.maximum(jnp.dot(x, w1, precision=hp) + b1, 0.0)
    h2 = jnp.maximum(jnp.dot(h1, w2, precision=hp) + b2, 0.0)
    return jnp.dot(h2, w3, precision=hp) + b3


if __name__ == "__main__":
    key = jax.random.PRNGKey(0)
    k_params, k_x1, k_x2 = jax.random.split(key, 3)
    params = init_params(k_params)
    packed = pack_params(params)          # hoisted: packed once, reused

    # Small batch forced through the Pallas kernel path (single padded chunk).
    x_small = jax.random.normal(k_x1, (8, OBSERVATIONS_DIM), jnp.float32)
    out_small = jax.block_until_ready(
        net_forward(x_small, packed, min_kernel_batch=0))
    ref_small = reference_forward(x_small, params)
    assert out_small.shape == (8, ACTIONS_DIM)
    assert jnp.allclose(out_small, ref_small, atol=1e-5, rtol=1e-5)

    # Same small batch through the default dispatch (dense fast path).
    out_fast = jax.block_until_ready(net_forward(x_small, packed))
    assert jnp.allclose(out_fast, ref_small, atol=1e-5, rtol=1e-5)

    # Large, non-multiple batch: multi-chunk blocks, multi-step "parallel"
    # grid, and tail padding in both the chunk and the batch dimension.
    x_big = jax.random.normal(k_x2, (20000, OBSERVATIONS_DIM), jnp.float32)
    out_big = jax.block_until_ready(net_forward(x_big, packed))
    ref_big = reference_forward(x_big, params)
    assert out_big.shape == (20000, ACTIONS_DIM)
    assert jnp.allclose(out_big, ref_big, atol=1e-5, rtol=1e-5)

    print("KERNEL_OK")
</pallas_src>

<mosaic_0001>
module attributes {stable_mosaic.version = 11 : i64} {
  func.func @_mlp_kernel(%arg0: i32, %arg1: memref<1x4x8x128xf32, #tpu.memory_space<vmem>>, %arg2: memref<4x16x8x128xf32, #tpu.memory_space<vmem>>, %arg3: memref<16x8x128xf32, #tpu.memory_space<vmem>>, %arg4: memref<16x16x8x128xf32, #tpu.memory_space<vmem>>, %arg5: memref<16x8x128xf32, #tpu.memory_space<vmem>>, %arg6: memref<16x2x8x128xf32, #tpu.memory_space<vmem>>, %arg7: memref<2x8x128xf32, #tpu.memory_space<vmem>>, %arg8: memref<1x2x8x128xf32, #tpu.memory_space<vmem>>) attributes {dimension_semantics = [#tpu.dimension_semantics<parallel>], iteration_bounds = array<i64: 1>, scalar_prefetch = 0 : i64, scratch_operands = 0 : i64, tpu.core_type = #tpu.core_type<tc>, window_params = [{transform_indices = @transform_0, window_bounds = array<i64: 1, 4, 8, 128>}, {pipeline_mode = #tpu.pipeline_mode<synchronous>, transform_indices = @transform_1, window_bounds = array<i64: 4, 16, 8, 128>}, {pipeline_mode = #tpu.pipeline_mode<synchronous>, transform_indices = @transform_2, window_bounds = array<i64: 16, 8, 128>}, {pipeline_mode = #tpu.pipeline_mode<synchronous>, transform_indices = @transform_3, window_bounds = array<i64: 16, 16, 8, 128>}, {pipeline_mode = #tpu.pipeline_mode<synchronous>, transform_indices = @transform_4, window_bounds = array<i64: 16, 8, 128>}, {pipeline_mode = #tpu.pipeline_mode<synchronous>, transform_indices = @transform_5, window_bounds = array<i64: 16, 2, 8, 128>}, {pipeline_mode = #tpu.pipeline_mode<synchronous>, transform_indices = @transform_6, window_bounds = array<i64: 2, 8, 128>}, {transform_indices = @transform_7, window_bounds = array<i64: 1, 2, 8, 128>}]} {
    %c0 = arith.constant 0 : index
    %c0_0 = arith.constant 0 : index
    %c0_1 = arith.constant 0 : index
    %c0_2 = arith.constant 0 : index
    %0 = vector.load %arg1[%c0, %c0_0, %c0_1, %c0_2] : memref<1x4x8x128xf32, #tpu.memory_space<vmem>>, vector<1x4x8x128xf32>
    %1 = vector.shape_cast %0 : vector<1x4x8x128xf32> to vector<4x8x128xf32>
    %c0_3 = arith.constant 0 : index
    %c0_4 = arith.constant 0 : index
    %c0_5 = arith.constant 0 : index
    %2 = vector.load %arg3[%c0_3, %c0_4, %c0_5] : memref<16x8x128xf32, #tpu.memory_space<vmem>>, vector<16x8x128xf32>
    %c0_6 = arith.constant 0 : index
    %c0_7 = arith.constant 0 : index
    %c0_8 = arith.constant 0 : index
    %c0_9 = arith.constant 0 : index
    %3 = vector.load %arg2[%c0_6, %c0_7, %c0_8, %c0_9] : memref<4x16x8x128xf32, #tpu.memory_space<vmem>>, vector<1x16x8x128xf32>
    %4 = vector.shape_cast %3 : vector<1x16x8x128xf32> to vector<16x8x128xf32>
    %5 = vector.extract_strided_slice %1 {offsets = [0, 0, 0], sizes = [1, 8, 128], strides = [1, 1, 1]} : vector<4x8x128xf32> to vector<1x8x128xf32>
    %6 = vector.shape_cast %5 : vector<1x8x128xf32> to vector<8x128xf32>
    %7 = vector.shape_cast %6 : vector<8x128xf32> to vector<1x8x128xf32>
    %8 = vector.broadcast %7 : vector<1x8x128xf32> to vector<16x8x128xf32>
    %9 = arith.mulf %4, %8 : vector<16x8x128xf32>
    %10 = arith.addf %2, %9 : vector<16x8x128xf32>
    %c1 = arith.constant 1 : index
    %c0_10 = arith.constant 0 : index
    %c0_11 = arith.constant 0 : index
    %c0_12 = arith.constant 0 : index
    %11 = vector.load %arg2[%c1, %c0_10, %c0_11, %c0_12] : memref<4x16x8x128xf32, #tpu.memory_space<vmem>>, vector<1x16x8x128xf32>
    %12 = vector.shape_cast %11 : vector<1x16x8x128xf32> to vector<16x8x128xf32>
    %13 = vector.extract_strided_slice %1 {offsets = [1, 0, 0], sizes = [1, 8, 128], strides = [1, 1, 1]} : vector<4x8x128xf32> to vector<1x8x128xf32>
    %14 = vector.shape_cast %13 : vector<1x8x128xf32> to vector<8x128xf32>
    %15 = vector.shape_cast %14 : vector<8x128xf32> to vector<1x8x128xf32>
    %16 = vector.broadcast %15 : vector<1x8x128xf32> to vector<16x8x128xf32>
    %17 = arith.mulf %12, %16 : vector<16x8x128xf32>
    %18 = arith.addf %10, %17 : vector<16x8x128xf32>
    %c2 = arith.constant 2 : index
    %c0_13 = arith.constant 0 : index
    %c0_14 = arith.constant 0 : index
    %c0_15 = arith.constant 0 : index
    %19 = vector.load %arg2[%c2, %c0_13, %c0_14, %c0_15] : memref<4x16x8x128xf32, #tpu.memory_space<vmem>>, vector<1x16x8x128xf32>
    %20 = vector.shape_cast %19 : vector<1x16x8x128xf32> to vector<16x8x128xf32>
    %21 = vector.extract_strided_slice %1 {offsets = [2, 0, 0], sizes = [1, 8, 128], strides = [1, 1, 1]} : vector<4x8x128xf32> to vector<1x8x128xf32>
    %22 = vector.shape_cast %21 : vector<1x8x128xf32> to vector<8x128xf32>
    %23 = vector.shape_cast %22 : vector<8x128xf32> to vector<1x8x128xf32>
    %24 = vector.broadcast %23 : vector<1x8x128xf32> to vector<16x8x128xf32>
    %25 = arith.mulf %20, %24 : vector<16x8x128xf32>
    %26 = arith.addf %18, %25 : vector<16x8x128xf32>
    %c3 = arith.constant 3 : index
    %c0_16 = arith.constant 0 : index
    %c0_17 = arith.constant 0 : index
    %c0_18 = arith.constant 0 : index
    %27 = vector.load %arg2[%c3, %c0_16, %c0_17, %c0_18] : memref<4x16x8x128xf32, #tpu.memory_space<vmem>>, vector<1x16x8x128xf32>
    %28 = vector.shape_cast %27 : vector<1x16x8x128xf32> to vector<16x8x128xf32>
    %29 = vector.extract_strided_slice %1 {offsets = [3, 0, 0], sizes = [1, 8, 128], strides = [1, 1, 1]} : vector<4x8x128xf32> to vector<1x8x128xf32>
    %30 = vector.shape_cast %29 : vector<1x8x128xf32> to vector<8x128xf32>
    %31 = vector.shape_cast %30 : vector<8x128xf32> to vector<1x8x128xf32>
    %32 = vector.broadcast %31 : vector<1x8x128xf32> to vector<16x8x128xf32>
    %33 = arith.mulf %28, %32 : vector<16x8x128xf32>
    %34 = arith.addf %26, %33 : vector<16x8x128xf32>
    %cst = arith.constant 0.000000e+00 : f32
    %35 = vector.broadcast %cst : f32 to vector<16x8x128xf32>
    %36 = arith.maximumf %34, %35 : vector<16x8x128xf32>
    %c0_19 = arith.constant 0 : index
    %c0_20 = arith.constant 0 : index
    %c0_21 = arith.constant 0 : index
    %37 = vector.load %arg5[%c0_19, %c0_20, %c0_21] : memref<16x8x128xf32, #tpu.memory_space<vmem>>, vector<16x8x128xf32>
    %c0_22 = arith.constant 0 : index
    %c0_23 = arith.constant 0 : index
    %c0_24 = arith.constant 0 : index
    %c0_25 = arith.constant 0 : index
    %38 = vector.load %arg4[%c0_22, %c0_23, %c0_24, %c0_25] : memref<16x16x8x128xf32, #tpu.memory_space<vmem>>, vector<1x16x8x128xf32>
    %39 = vector.shape_cast %38 : vector<1x16x8x128xf32> to vector<16x8x128xf32>
    %40 = vector.extract_strided_slice %36 {offsets = [0, 0, 0], sizes = [1, 8, 128], strides = [1, 1, 1]} : vector<16x8x128xf32> to vector<1x8x128xf32>
    %41 = vector.shape_cast %40 : vector<1x8x128xf32> to vector<8x128xf32>
    %42 = vector.shape_cast %41 : vector<8x128xf32> to vector<1x8x128xf32>
    %43 = vector.broadcast %42 : vector<1x8x128xf32> to vector<16x8x128xf32>
    %44 = arith.mulf %39, %43 : vector<16x8x128xf32>
    %45 = arith.addf %37, %44 : vector<16x8x128xf32>
    %c1_26 = arith.constant 1 : index
    %c0_27 = arith.constant 0 : index
    %c0_28 = arith.constant 0 : index
    %c0_29 = arith.constant 0 : index
    %46 = vector.load %arg4[%c1_26, %c0_27, %c0_28, %c0_29] : memref<16x16x8x128xf32, #tpu.memory_space<vmem>>, vector<1x16x8x128xf32>
    %47 = vector.shape_cast %46 : vector<1x16x8x128xf32> to vector<16x8x128xf32>
    %48 = vector.extract_strided_slice %36 {offsets = [1, 0, 0], sizes = [1, 8, 128], strides = [1, 1, 1]} : vector<16x8x128xf32> to vector<1x8x128xf32>
    %49 = vector.shape_cast %48 : vector<1x8x128xf32> to vector<8x128xf32>
    %50 = vector.shape_cast %49 : vector<8x128xf32> to vector<1x8x128xf32>
    %51 = vector.broadcast %50 : vector<1x8x128xf32> to vector<16x8x128xf32>
    %52 = arith.mulf %47, %51 : vector<16x8x128xf32>
    %53 = arith.addf %45, %52 : vector<16x8x128xf32>
    %c2_30 = arith.constant 2 : index
    %c0_31 = arith.constant 0 : index
    %c0_32 = arith.constant 0 : index
    %c0_33 = arith.constant 0 : index
    %54 = vector.load %arg4[%c2_30, %c0_31, %c0_32, %c0_33] : memref<16x16x8x128xf32, #tpu.memory_space<vmem>>, vector<1x16x8x128xf32>
    %55 = vector.shape_cast %54 : vector<1x16x8x128xf32> to vector<16x8x128xf32>
    %56 = vector.extract_strided_slice %36 {offsets = [2, 0, 0], sizes = [1, 8, 128], strides = [1, 1, 1]} : vector<16x8x128xf32> to vector<1x8x128xf32>
    %57 = vector.shape_cast %56 : vector<1x8x128xf32> to vector<8x128xf32>
    %58 = vector.shape_cast %57 : vector<8x128xf32> to vector<1x8x128xf32>
    %59 = vector.broadcast %58 : vector<1x8x128xf32> to vector<16x8x128xf32>
    %60 = arith.mulf %55, %59 : vector<16x8x128xf32>
    %61 = arith.addf %53, %60 : vector<16x8x128xf32>
    %c3_34 = arith.constant 3 : index
    %c0_35 = arith.constant 0 : index
    %c0_36 = arith.constant 0 : index
    %c0_37 = arith.constant 0 : index
    %62 = vector.load %arg4[%c3_34, %c0_35, %c0_36, %c0_37] : memref<16x16x8x128xf32, #tpu.memory_space<vmem>>, vector<1x16x8x128xf32>
    %63 = vector.shape_cast %62 : vector<1x16x8x128xf32> to vector<16x8x128xf32>
    %64 = vector.extract_strided_slice %36 {offsets = [3, 0, 0], sizes = [1, 8, 128], strides = [1, 1, 1]} : vector<16x8x128xf32> to vector<1x8x128xf32>
    %65 = vector.shape_cast %64 : vector<1x8x128xf32> to vector<8x128xf32>
    %66 = vector.shape_cast %65 : vector<8x128xf32> to vector<1x8x128xf32>
    %67 = vector.broadcast %66 : vector<1x8x128xf32> to vector<16x8x128xf32>
    %68 = arith.mulf %63, %67 : vector<16x8x128xf32>
    %69 = arith.addf %61, %68 : vector<16x8x128xf32>
    %c4 = arith.constant 4 : index
    %c0_38 = arith.constant 0 : index
    %c0_39 = arith.constant 0 : index
    %c0_40 = arith.constant 0 : index
    %70 = vector.load %arg4[%c4, %c0_38, %c0_39, %c0_40] : memref<16x16x8x128xf32, #tpu.memory_space<vmem>>, vector<1x16x8x128xf32>
    %71 = vector.shape_cast %70 : vector<1x16x8x128xf32> to vector<16x8x128xf32>
    %72 = vector.extract_strided_slice %36 {offsets = [4, 0, 0], sizes = [1, 8, 128], strides = [1, 1, 1]} : vector<16x8x128xf32> to vector<1x8x128xf32>
    %73 = vector.shape_cast %72 : vector<1x8x128xf32> to vector<8x128xf32>
    %74 = vector.shape_cast %73 : vector<8x128xf32> to vector<1x8x128xf32>
    %75 = vector.broadcast %74 : vector<1x8x128xf32> to vector<16x8x128xf32>
    %76 = arith.mulf %71, %75 : vector<16x8x128xf32>
    %77 = arith.addf %69, %76 : vector<16x8x128xf32>
    %c5 = arith.constant 5 : index
    %c0_41 = arith.constant 0 : index
    %c0_42 = arith.constant 0 : index
    %c0_43 = arith.constant 0 : index
    %78 = vector.load %arg4[%c5, %c0_41, %c0_42, %c0_43] : memref<16x16x8x128xf32, #tpu.memory_space<vmem>>, vector<1x16x8x128xf32>
    %79 = vector.shape_cast %78 : vector<1x16x8x128xf32> to vector<16x8x128xf32>
    %80 = vector.extract_strided_slice %36 {offsets = [5, 0, 0], sizes = [1, 8, 128], strides = [1, 1, 1]} : vector<16x8x128xf32> to vector<1x8x128xf32>
    %81 = vector.shape_cast %80 : vector<1x8x128xf32> to vector<8x128xf32>
    %82 = vector.shape_cast %81 : vector<8x128xf32> to vector<1x8x128xf32>
    %83 = vector.broadcast %82 : vector<1x8x128xf32> to vector<16x8x128xf32>
    %84 = arith.mulf %79, %83 : vector<16x8x128xf32>
    %85 = arith.addf %77, %84 : vector<16x8x128xf32>
    %c6 = arith.constant 6 : index
    %c0_44 = arith.constant 0 : index
    %c0_45 = arith.constant 0 : index
    %c0_46 = arith.constant 0 : index
    %86 = vector.load %arg4[%c6, %c0_44, %c0_45, %c0_46] : memref<16x16x8x128xf32, #tpu.memory_space<vmem>>, vector<1x16x8x128xf32>
    %87 = vector.shape_cast %86 : vector<1x16x8x128xf32> to vector<16x8x128xf32>
    %88 = vector.extract_strided_slice %36 {offsets = [6, 0, 0], sizes = [1, 8, 128], strides = [1, 1, 1]} : vector<16x8x128xf32> to vector<1x8x128xf32>
    %89 = vector.shape_cast %88 : vector<1x8x128xf32> to vector<8x128xf32>
    %90 = vector.shape_cast %89 : vector<8x128xf32> to vector<1x8x128xf32>
    %91 = vector.broadcast %90 : vector<1x8x128xf32> to vector<16x8x128xf32>
    %92 = arith.mulf %87, %91 : vector<16x8x128xf32>
    %93 = arith.addf %85, %92 : vector<16x8x128xf32>
    %c7 = arith.constant 7 : index
    %c0_47 = arith.constant 0 : index
    %c0_48 = arith.constant 0 : index
    %c0_49 = arith.constant 0 : index
    %94 = vector.load %arg4[%c7, %c0_47, %c0_48, %c0_49] : memref<16x16x8x128xf32, #tpu.memory_space<vmem>>, vector<1x16x8x128xf32>
    %95 = vector.shape_cast %94 : vector<1x16x8x128xf32> to vector<16x8x128xf32>
    %96 = vector.extract_strided_slice %36 {offsets = [7, 0, 0], sizes = [1, 8, 128], strides = [1, 1, 1]} : vector<16x8x128xf32> to vector<1x8x128xf32>
    %97 = vector.shape_cast %96 : vector<1x8x128xf32> to vector<8x128xf32>
    %98 = vector.shape_cast %97 : vector<8x128xf32> to vector<1x8x128xf32>
    %99 = vector.broadcast %98 : vector<1x8x128xf32> to vector<16x8x128xf32>
    %100 = arith.mulf %95, %99 : vector<16x8x128xf32>
    %101 = arith.addf %93, %100 : vector<16x8x128xf32>
    %c8 = arith.constant 8 : index
    %c0_50 = arith.constant 0 : index
    %c0_51 = arith.constant 0 : index
    %c0_52 = arith.constant 0 : index
    %102 = vector.load %arg4[%c8, %c0_50, %c0_51, %c0_52] : memref<16x16x8x128xf32, #tpu.memory_space<vmem>>, vector<1x16x8x128xf32>
    %103 = vector.shape_cast %102 : vector<1x16x8x128xf32> to vector<16x8x128xf32>
    %104 = vector.extract_strided_slice %36 {offsets = [8, 0, 0], sizes = [1, 8, 128], strides = [1, 1, 1]} : vector<16x8x128xf32> to vector<1x8x128xf32>
    %105 = vector.shape_cast %104 : vector<1x8x128xf32> to vector<8x128xf32>
    %106 = vector.shape_cast %105 : vector<8x128xf32> to vector<1x8x128xf32>
    %107 = vector.broadcast %106 : vector<1x8x128xf32> to vector<16x8x128xf32>
    %108 = arith.mulf %103, %107 : vector<16x8x128xf32>
    %109 = arith.addf %101, %108 : vector<16x8x128xf32>
    %c9 = arith.constant 9 : index
    %c0_53 = arith.constant 0 : index
    %c0_54 = arith.constant 0 : index
    %c0_55 = arith.constant 0 : index
    %110 = vector.load %arg4[%c9, %c0_53, %c0_54, %c0_55] : memref<16x16x8x128xf32, #tpu.memory_space<vmem>>, vector<1x16x8x128xf32>
    %111 = vector.shape_cast %110 : vector<1x16x8x128xf32> to vector<16x8x128xf32>
    %112 = vector.extract_strided_slice %36 {offsets = [9, 0, 0], sizes = [1, 8, 128], strides = [1, 1, 1]} : vector<16x8x128xf32> to vector<1x8x128xf32>
    %113 = vector.shape_cast %112 : vector<1x8x128xf32> to vector<8x128xf32>
    %114 = vector.shape_cast %113 : vector<8x128xf32> to vector<1x8x128xf32>
    %115 = vector.broadcast %114 : vector<1x8x128xf32> to vector<16x8x128xf32>
    %116 = arith.mulf %111, %115 : vector<16x8x128xf32>
    %117 = arith.addf %109, %116 : vector<16x8x128xf32>
    %c10 = arith.constant 10 : index
    %c0_56 = arith.constant 0 : index
    %c0_57 = arith.constant 0 : index
    %c0_58 = arith.constant 0 : index
    %118 = vector.load %arg4[%c10, %c0_56, %c0_57, %c0_58] : memref<16x16x8x128xf32, #tpu.memory_space<vmem>>, vector<1x16x8x128xf32>
    %119 = vector.shape_cast %118 : vector<1x16x8x128xf32> to vector<16x8x128xf32>
    %120 = vector.extract_strided_slice %36 {offsets = [10, 0, 0], sizes = [1, 8, 128], strides = [1, 1, 1]} : vector<16x8x128xf32> to vector<1x8x128xf32>
    %121 = vector.shape_cast %120 : vector<1x8x128xf32> to vector<8x128xf32>
    %122 = vector.shape_cast %121 : vector<8x128xf32> to vector<1x8x128xf32>
    %123 = vector.broadcast %122 : vector<1x8x128xf32> to vector<16x8x128xf32>
    %124 = arith.mulf %119, %123 : vector<16x8x128xf32>
    %125 = arith.addf %117, %124 : vector<16x8x128xf32>
    %c11 = arith.constant 11 : index
    %c0_59 = arith.constant 0 : index
    %c0_60 = arith.constant 0 : index
    %c0_61 = arith.constant 0 : index
    %126 = vector.load %arg4[%c11, %c0_59, %c0_60, %c0_61] : memref<16x16x8x128xf32, #tpu.memory_space<vmem>>, vector<1x16x8x128xf32>
    %127 = vector.shape_cast %126 : vector<1x16x8x128xf32> to vector<16x8x128xf32>
    %128 = vector.extract_strided_slice %36 {offsets = [11, 0, 0], sizes = [1, 8, 128], strides = [1, 1, 1]} : vector<16x8x128xf32> to vector<1x8x128xf32>
    %129 = vector.shape_cast %128 : vector<1x8x128xf32> to vector<8x128xf32>
    %130 = vector.shape_cast %129 : vector<8x128xf32> to vector<1x8x128xf32>
    %131 = vector.broadcast %130 : vector<1x8x128xf32> to vector<16x8x128xf32>
    %132 = arith.mulf %127, %131 : vector<16x8x128xf32>
    %133 = arith.addf %125, %132 : vector<16x8x128xf32>
    %c12 = arith.constant 12 : index
    %c0_62 = arith.constant 0 : index
    %c0_63 = arith.constant 0 : index
    %c0_64 = arith.constant 0 : index
    %134 = vector.load %arg4[%c12, %c0_62, %c0_63, %c0_64] : memref<16x16x8x128xf32, #tpu.memory_space<vmem>>, vector<1x16x8x128xf32>
    %135 = vector.shape_cast %134 : vector<1x16x8x128xf32> to vector<16x8x128xf32>
    %136 = vector.extract_strided_slice %36 {offsets = [12, 0, 0], sizes = [1, 8, 128], strides = [1, 1, 1]} : vector<16x8x128xf32> to vector<1x8x128xf32>
    %137 = vector.shape_cast %136 : vector<1x8x128xf32> to vector<8x128xf32>
    %138 = vector.shape_cast %137 : vector<8x128xf32> to vector<1x8x128xf32>
    %139 = vector.broadcast %138 : vector<1x8x128xf32> to vector<16x8x128xf32>
    %140 = arith.mulf %135, %139 : vector<16x8x128xf32>
    %141 = arith.addf %133, %140 : vector<16x8x128xf32>
    %c13 = arith.constant 13 : index
    %c0_65 = arith.constant 0 : index
    %c0_66 = arith.constant 0 : index
    %c0_67 = arith.constant 0 : index
    %142 = vector.load %arg4[%c13, %c0_65, %c0_66, %c0_67] : memref<16x16x8x128xf32, #tpu.memory_space<vmem>>, vector<1x16x8x128xf32>
    %143 = vector.shape_cast %142 : vector<1x16x8x128xf32> to vector<16x8x128xf32>
    %144 = vector.extract_strided_slice %36 {offsets = [13, 0, 0], sizes = [1, 8, 128], strides = [1, 1, 1]} : vector<16x8x128xf32> to vector<1x8x128xf32>
    %145 = vector.shape_cast %144 : vector<1x8x128xf32> to vector<8x128xf32>
    %146 = vector.shape_cast %145 : vector<8x128xf32> to vector<1x8x128xf32>
    %147 = vector.broadcast %146 : vector<1x8x128xf32> to vector<16x8x128xf32>
    %148 = arith.mulf %143, %147 : vector<16x8x128xf32>
    %149 = arith.addf %141, %148 : vector<16x8x128xf32>
    %c14 = arith.constant 14 : index
    %c0_68 = arith.constant 0 : index
    %c0_69 = arith.constant 0 : index
    %c0_70 = arith.constant 0 : index
    %150 = vector.load %arg4[%c14, %c0_68, %c0_69, %c0_70] : memref<16x16x8x128xf32, #tpu.memory_space<vmem>>, vector<1x16x8x128xf32>
    %151 = vector.shape_cast %150 : vector<1x16x8x128xf32> to vector<16x8x128xf32>
    %152 = vector.extract_strided_slice %36 {offsets = [14, 0, 0], sizes = [1, 8, 128], strides = [1, 1, 1]} : vector<16x8x128xf32> to vector<1x8x128xf32>
    %153 = vector.shape_cast %152 : vector<1x8x128xf32> to vector<8x128xf32>
    %154 = vector.shape_cast %153 : vector<8x128xf32> to vector<1x8x128xf32>
    %155 = vector.broadcast %154 : vector<1x8x128xf32> to vector<16x8x128xf32>
    %156 = arith.mulf %151, %155 : vector<16x8x128xf32>
    %157 = arith.addf %149, %156 : vector<16x8x128xf32>
    %c15 = arith.constant 15 : index
    %c0_71 = arith.constant 0 : index
    %c0_72 = arith.constant 0 : index
    %c0_73 = arith.constant 0 : index
    %158 = vector.load %arg4[%c15, %c0_71, %c0_72, %c0_73] : memref<16x16x8x128xf32, #tpu.memory_space<vmem>>, vector<1x16x8x128xf32>
    %159 = vector.shape_cast %158 : vector<1x16x8x128xf32> to vector<16x8x128xf32>
    %160 = vector.extract_strided_slice %36 {offsets = [15, 0, 0], sizes = [1, 8, 128], strides = [1, 1, 1]} : vector<16x8x128xf32> to vector<1x8x128xf32>
    %161 = vector.shape_cast %160 : vector<1x8x128xf32> to vector<8x128xf32>
    %162 = vector.shape_cast %161 : vector<8x128xf32> to vector<1x8x128xf32>
    %163 = vector.broadcast %162 : vector<1x8x128xf32> to vector<16x8x128xf32>
    %164 = arith.mulf %159, %163 : vector<16x8x128xf32>
    %165 = arith.addf %157, %164 : vector<16x8x128xf32>
    %cst_74 = arith.constant 0.000000e+00 : f32
    %166 = vector.broadcast %cst_74 : f32 to vector<16x8x128xf32>
    %167 = arith.maximumf %165, %166 : vector<16x8x128xf32>
    %c0_75 = arith.constant 0 : index
    %c0_76 = arith.constant 0 : index
    %c0_77 = arith.constant 0 : index
    %168 = vector.load %arg7[%c0_75, %c0_76, %c0_77] : memref<2x8x128xf32, #tpu.memory_space<vmem>>, vector<2x8x128xf32>
    %c0_78 = arith.constant 0 : index
    %c0_79 = arith.constant 0 : index
    %c0_80 = arith.constant 0 : index
    %c0_81 = arith.constant 0 : index
    %169 = vector.load %arg6[%c0_78, %c0_79, %c0_80, %c0_81] : memref<16x2x8x128xf32, #tpu.memory_space<vmem>>, vector<1x2x8x128xf32>
    %170 = vector.shape_cast %169 : vector<1x2x8x128xf32> to vector<2x8x128xf32>
    %171 = vector.extract_strided_slice %167 {offsets = [0, 0, 0], sizes = [1, 8, 128], strides = [1, 1, 1]} : vector<16x8x128xf32> to vector<1x8x128xf32>
    %172 = vector.shape_cast %171 : vector<1x8x128xf32> to vector<8x128xf32>
    %173 = vector.shape_cast %172 : vector<8x128xf32> to vector<1x8x128xf32>
    %174 = vector.broadcast %173 : vector<1x8x128xf32> to vector<2x8x128xf32>
    %175 = arith.mulf %170, %174 : vector<2x8x128xf32>
    %176 = arith.addf %168, %175 : vector<2x8x128xf32>
    %c1_82 = arith.constant 1 : index
    %c0_83 = arith.constant 0 : index
    %c0_84 = arith.constant 0 : index
    %c0_85 = arith.constant 0 : index
    %177 = vector.load %arg6[%c1_82, %c0_83, %c0_84, %c0_85] : memref<16x2x8x128xf32, #tpu.memory_space<vmem>>, vector<1x2x8x128xf32>
    %178 = vector.shape_cast %177 : vector<1x2x8x128xf32> to vector<2x8x128xf32>
    %179 = vector.extract_strided_slice %167 {offsets = [1, 0, 0], sizes = [1, 8, 128], strides = [1, 1, 1]} : vector<16x8x128xf32> to vector<1x8x128xf32>
    %180 = vector.shape_cast %179 : vector<1x8x128xf32> to vector<8x128xf32>
    %181 = vector.shape_cast %180 : vector<8x128xf32> to vector<1x8x128xf32>
    %182 = vector.broadcast %181 : vector<1x8x128xf32> to vector<2x8x128xf32>
    %183 = arith.mulf %178, %182 : vector<2x8x128xf32>
    %184 = arith.addf %176, %183 : vector<2x8x128xf32>
    %c2_86 = arith.constant 2 : index
    %c0_87 = arith.constant 0 : index
    %c0_88 = arith.constant 0 : index
    %c0_89 = arith.constant 0 : index
    %185 = vector.load %arg6[%c2_86, %c0_87, %c0_88, %c0_89] : memref<16x2x8x128xf32, #tpu.memory_space<vmem>>, vector<1x2x8x128xf32>
    %186 = vector.shape_cast %185 : vector<1x2x8x128xf32> to vector<2x8x128xf32>
    %187 = vector.extract_strided_slice %167 {offsets = [2, 0, 0], sizes = [1, 8, 128], strides = [1, 1, 1]} : vector<16x8x128xf32> to vector<1x8x128xf32>
    %188 = vector.shape_cast %187 : vector<1x8x128xf32> to vector<8x128xf32>
    %189 = vector.shape_cast %188 : vector<8x128xf32> to vector<1x8x128xf32>
    %190 = vector.broadcast %189 : vector<1x8x128xf32> to vector<2x8x128xf32>
    %191 = arith.mulf %186, %190 : vector<2x8x128xf32>
    %192 = arith.addf %184, %191 : vector<2x8x128xf32>
    %c3_90 = arith.constant 3 : index
    %c0_91 = arith.constant 0 : index
    %c0_92 = arith.constant 0 : index
    %c0_93 = arith.constant 0 : index
    %193 = vector.load %arg6[%c3_90, %c0_91, %c0_92, %c0_93] : memref<16x2x8x128xf32, #tpu.memory_space<vmem>>, vector<1x2x8x128xf32>
    %194 = vector.shape_cast %193 : vector<1x2x8x128xf32> to vector<2x8x128xf32>
    %195 = vector.extract_strided_slice %167 {offsets = [3, 0, 0], sizes = [1, 8, 128], strides = [1, 1, 1]} : vector<16x8x128xf32> to vector<1x8x128xf32>
    %196 = vector.shape_cast %195 : vector<1x8x128xf32> to vector<8x128xf32>
    %197 = vector.shape_cast %196 : vector<8x128xf32> to vector<1x8x128xf32>
    %198 = vector.broadcast %197 : vector<1x8x128xf32> to vector<2x8x128xf32>
    %199 = arith.mulf %194, %198 : vector<2x8x128xf32>
    %200 = arith.addf %192, %199 : vector<2x8x128xf32>
    %c4_94 = arith.constant 4 : index
    %c0_95 = arith.constant 0 : index
    %c0_96 = arith.constant 0 : index
    %c0_97 = arith.constant 0 : index
    %201 = vector.load %arg6[%c4_94, %c0_95, %c0_96, %c0_97] : memref<16x2x8x128xf32, #tpu.memory_space<vmem>>, vector<1x2x8x128xf32>
    %202 = vector.shape_cast %201 : vector<1x2x8x128xf32> to vector<2x8x128xf32>
    %203 = vector.extract_strided_slice %167 {offsets = [4, 0, 0], sizes = [1, 8, 128], strides = [1, 1, 1]} : vector<16x8x128xf32> to vector<1x8x128xf32>
    %204 = vector.shape_cast %203 : vector<1x8x128xf32> to vector<8x128xf32>
    %205 = vector.shape_cast %204 : vector<8x128xf32> to vector<1x8x128xf32>
    %206 = vector.broadcast %205 : vector<1x8x128xf32> to vector<2x8x128xf32>
    %207 = arith.mulf %202, %206 : vector<2x8x128xf32>
    %208 = arith.addf %200, %207 : vector<2x8x128xf32>
    %c5_98 = arith.constant 5 : index
    %c0_99 = arith.constant 0 : index
    %c0_100 = arith.constant 0 : index
    %c0_101 = arith.constant 0 : index
    %209 = vector.load %arg6[%c5_98, %c0_99, %c0_100, %c0_101] : memref<16x2x8x128xf32, #tpu.memory_space<vmem>>, vector<1x2x8x128xf32>
    %210 = vector.shape_cast %209 : vector<1x2x8x128xf32> to vector<2x8x128xf32>
    %211 = vector.extract_strided_slice %167 {offsets = [5, 0, 0], sizes = [1, 8, 128], strides = [1, 1, 1]} : vector<16x8x128xf32> to vector<1x8x128xf32>
    %212 = vector.shape_cast %211 : vector<1x8x128xf32> to vector<8x128xf32>
    %213 = vector.shape_cast %212 : vector<8x128xf32> to vector<1x8x128xf32>
    %214 = vector.broadcast %213 : vector<1x8x128xf32> to vector<2x8x128xf32>
    %215 = arith.mulf %210, %214 : vector<2x8x128xf32>
    %216 = arith.addf %208, %215 : vector<2x8x128xf32>
    %c6_102 = arith.constant 6 : index
    %c0_103 = arith.constant 0 : index
    %c0_104 = arith.constant 0 : index
    %c0_105 = arith.constant 0 : index
    %217 = vector.load %arg6[%c6_102, %c0_103, %c0_104, %c0_105] : memref<16x2x8x128xf32, #tpu.memory_space<vmem>>, vector<1x2x8x128xf32>
    %218 = vector.shape_cast %217 : vector<1x2x8x128xf32> to vector<2x8x128xf32>
    %219 = vector.extract_strided_slice %167 {offsets = [6, 0, 0], sizes = [1, 8, 128], strides = [1, 1, 1]} : vector<16x8x128xf32> to vector<1x8x128xf32>
    %220 = vector.shape_cast %219 : vector<1x8x128xf32> to vector<8x128xf32>
    %221 = vector.shape_cast %220 : vector<8x128xf32> to vector<1x8x128xf32>
    %222 = vector.broadcast %221 : vector<1x8x128xf32> to vector<2x8x128xf32>
    %223 = arith.mulf %218, %222 : vector<2x8x128xf32>
    %224 = arith.addf %216, %223 : vector<2x8x128xf32>
    %c7_106 = arith.constant 7 : index
    %c0_107 = arith.constant 0 : index
    %c0_108 = arith.constant 0 : index
    %c0_109 = arith.constant 0 : index
    %225 = vector.load %arg6[%c7_106, %c0_107, %c0_108, %c0_109] : memref<16x2x8x128xf32, #tpu.memory_space<vmem>>, vector<1x2x8x128xf32>
    %226 = vector.shape_cast %225 : vector<1x2x8x128xf32> to vector<2x8x128xf32>
    %227 = vector.extract_strided_slice %167 {offsets = [7, 0, 0], sizes = [1, 8, 128], strides = [1, 1, 1]} : vector<16x8x128xf32> to vector<1x8x128xf32>
    %228 = vector.shape_cast %227 : vector<1x8x128xf32> to vector<8x128xf32>
    %229 = vector.shape_cast %228 : vector<8x128xf32> to vector<1x8x128xf32>
    %230 = vector.broadcast %229 : vector<1x8x128xf32> to vector<2x8x128xf32>
    %231 = arith.mulf %226, %230 : vector<2x8x128xf32>
    %232 = arith.addf %224, %231 : vector<2x8x128xf32>
    %c8_110 = arith.constant 8 : index
    %c0_111 = arith.constant 0 : index
    %c0_112 = arith.constant 0 : index
    %c0_113 = arith.constant 0 : index
    %233 = vector.load %arg6[%c8_110, %c0_111, %c0_112, %c0_113] : memref<16x2x8x128xf32, #tpu.memory_space<vmem>>, vector<1x2x8x128xf32>
    %234 = vector.shape_cast %233 : vector<1x2x8x128xf32> to vector<2x8x128xf32>
    %235 = vector.extract_strided_slice %167 {offsets = [8, 0, 0], sizes = [1, 8, 128], strides = [1, 1, 1]} : vector<16x8x128xf32> to vector<1x8x128xf32>
    %236 = vector.shape_cast %235 : vector<1x8x128xf32> to vector<8x128xf32>
    %237 = vector.shape_cast %236 : vector<8x128xf32> to vector<1x8x128xf32>
    %238 = vector.broadcast %237 : vector<1x8x128xf32> to vector<2x8x128xf32>
    %239 = arith.mulf %234, %238 : vector<2x8x128xf32>
    %240 = arith.addf %232, %239 : vector<2x8x128xf32>
    %c9_114 = arith.constant 9 : index
    %c0_115 = arith.constant 0 : index
    %c0_116 = arith.constant 0 : index
    %c0_117 = arith.constant 0 : index
    %241 = vector.load %arg6[%c9_114, %c0_115, %c0_116, %c0_117] : memref<16x2x8x128xf32, #tpu.memory_space<vmem>>, vector<1x2x8x128xf32>
    %242 = vector.shape_cast %241 : vector<1x2x8x128xf32> to vector<2x8x128xf32>
    %243 = vector.extract_strided_slice %167 {offsets = [9, 0, 0], sizes = [1, 8, 128], strides = [1, 1, 1]} : vector<16x8x128xf32> to vector<1x8x128xf32>
    %244 = vector.shape_cast %243 : vector<1x8x128xf32> to vector<8x128xf32>
    %245 = vector.shape_cast %244 : vector<8x128xf32> to vector<1x8x128xf32>
    %246 = vector.broadcast %245 : vector<1x8x128xf32> to vector<2x8x128xf32>
    %247 = arith.mulf %242, %246 : vector<2x8x128xf32>
    %248 = arith.addf %240, %247 : vector<2x8x128xf32>
    %c10_118 = arith.constant 10 : index
    %c0_119 = arith.constant 0 : index
    %c0_120 = arith.constant 0 : index
    %c0_121 = arith.constant 0 : index
    %249 = vector.load %arg6[%c10_118, %c0_119, %c0_120, %c0_121] : memref<16x2x8x128xf32, #tpu.memory_space<vmem>>, vector<1x2x8x128xf32>
    %250 = vector.shape_cast %249 : vector<1x2x8x128xf32> to vector<2x8x128xf32>
    %251 = vector.extract_strided_slice %167 {offsets = [10, 0, 0], sizes = [1, 8, 128], strides = [1, 1, 1]} : vector<16x8x128xf32> to vector<1x8x128xf32>
    %252 = vector.shape_cast %251 : vector<1x8x128xf32> to vector<8x128xf32>
    %253 = vector.shape_cast %252 : vector<8x128xf32> to vector<1x8x128xf32>
    %254 = vector.broadcast %253 : vector<1x8x128xf32> to vector<2x8x128xf32>
    %255 = arith.mulf %250, %254 : vector<2x8x128xf32>
    %256 = arith.addf %248, %255 : vector<2x8x128xf32>
    %c11_122 = arith.constant 11 : index
    %c0_123 = arith.constant 0 : index
    %c0_124 = arith.constant 0 : index
    %c0_125 = arith.constant 0 : index
    %257 = vector.load %arg6[%c11_122, %c0_123, %c0_124, %c0_125] : memref<16x2x8x128xf32, #tpu.memory_space<vmem>>, vector<1x2x8x128xf32>
    %258 = vector.shape_cast %257 : vector<1x2x8x128xf32> to vector<2x8x128xf32>
    %259 = vector.extract_strided_slice %167 {offsets = [11, 0, 0], sizes = [1, 8, 128], strides = [1, 1, 1]} : vector<16x8x128xf32> to vector<1x8x128xf32>
    %260 = vector.shape_cast %259 : vector<1x8x128xf32> to vector<8x128xf32>
    %261 = vector.shape_cast %260 : vector<8x128xf32> to vector<1x8x128xf32>
    %262 = vector.broadcast %261 : vector<1x8x128xf32> to vector<2x8x128xf32>
    %263 = arith.mulf %258, %262 : vector<2x8x128xf32>
    %264 = arith.addf %256, %263 : vector<2x8x128xf32>
    %c12_126 = arith.constant 12 : index
    %c0_127 = arith.constant 0 : index
    %c0_128 = arith.constant 0 : index
    %c0_129 = arith.constant 0 : index
    %265 = vector.load %arg6[%c12_126, %c0_127, %c0_128, %c0_129] : memref<16x2x8x128xf32, #tpu.memory_space<vmem>>, vector<1x2x8x128xf32>
    %266 = vector.shape_cast %265 : vector<1x2x8x128xf32> to vector<2x8x128xf32>
    %267 = vector.extract_strided_slice %167 {offsets = [12, 0, 0], sizes = [1, 8, 128], strides = [1, 1, 1]} : vector<16x8x128xf32> to vector<1x8x128xf32>
    %268 = vector.shape_cast %267 : vector<1x8x128xf32> to vector<8x128xf32>
    %269 = vector.shape_cast %268 : vector<8x128xf32> to vector<1x8x128xf32>
    %270 = vector.broadcast %269 : vector<1x8x128xf32> to vector<2x8x128xf32>
    %271 = arith.mulf %266, %270 : vector<2x8x128xf32>
    %272 = arith.addf %264, %271 : vector<2x8x128xf32>
    %c13_130 = arith.constant 13 : index
    %c0_131 = arith.constant 0 : index
    %c0_132 = arith.constant 0 : index
    %c0_133 = arith.constant 0 : index
    %273 = vector.load %arg6[%c13_130, %c0_131, %c0_132, %c0_133] : memref<16x2x8x128xf32, #tpu.memory_space<vmem>>, vector<1x2x8x128xf32>
    %274 = vector.shape_cast %273 : vector<1x2x8x128xf32> to vector<2x8x128xf32>
    %275 = vector.extract_strided_slice %167 {offsets = [13, 0, 0], sizes = [1, 8, 128], strides = [1, 1, 1]} : vector<16x8x128xf32> to vector<1x8x128xf32>
    %276 = vector.shape_cast %275 : vector<1x8x128xf32> to vector<8x128xf32>
    %277 = vector.shape_cast %276 : vector<8x128xf32> to vector<1x8x128xf32>
    %278 = vector.broadcast %277 : vector<1x8x128xf32> to vector<2x8x128xf32>
    %279 = arith.mulf %274, %278 : vector<2x8x128xf32>
    %280 = arith.addf %272, %279 : vector<2x8x128xf32>
    %c14_134 = arith.constant 14 : index
    %c0_135 = arith.constant 0 : index
    %c0_136 = arith.constant 0 : index
    %c0_137 = arith.constant 0 : index
    %281 = vector.load %arg6[%c14_134, %c0_135, %c0_136, %c0_137] : memref<16x2x8x128xf32, #tpu.memory_space<vmem>>, vector<1x2x8x128xf32>
    %282 = vector.shape_cast %281 : vector<1x2x8x128xf32> to vector<2x8x128xf32>
    %283 = vector.extract_strided_slice %167 {offsets = [14, 0, 0], sizes = [1, 8, 128], strides = [1, 1, 1]} : vector<16x8x128xf32> to vector<1x8x128xf32>
    %284 = vector.shape_cast %283 : vector<1x8x128xf32> to vector<8x128xf32>
    %285 = vector.shape_cast %284 : vector<8x128xf32> to vector<1x8x128xf32>
    %286 = vector.broadcast %285 : vector<1x8x128xf32> to vector<2x8x128xf32>
    %287 = arith.mulf %282, %286 : vector<2x8x128xf32>
    %288 = arith.addf %280, %287 : vector<2x8x128xf32>
    %c15_138 = arith.constant 15 : index
    %c0_139 = arith.constant 0 : index
    %c0_140 = arith.constant 0 : index
    %c0_141 = arith.constant 0 : index
    %289 = vector.load %arg6[%c15_138, %c0_139, %c0_140, %c0_141] : memref<16x2x8x128xf32, #tpu.memory_space<vmem>>, vector<1x2x8x128xf32>
    %290 = vector.shape_cast %289 : vector<1x2x8x128xf32> to vector<2x8x128xf32>
    %291 = vector.extract_strided_slice %167 {offsets = [15, 0, 0], sizes = [1, 8, 128], strides = [1, 1, 1]} : vector<16x8x128xf32> to vector<1x8x128xf32>
    %292 = vector.shape_cast %291 : vector<1x8x128xf32> to vector<8x128xf32>
    %293 = vector.shape_cast %292 : vector<8x128xf32> to vector<1x8x128xf32>
    %294 = vector.broadcast %293 : vector<1x8x128xf32> to vector<2x8x128xf32>
    %295 = arith.mulf %290, %294 : vector<2x8x128xf32>
    %296 = arith.addf %288, %295 : vector<2x8x128xf32>
    %c0_142 = arith.constant 0 : index
    %c0_143 = arith.constant 0 : index
    %c0_144 = arith.constant 0 : index
    %c0_145 = arith.constant 0 : index
    %297 = vector.load %arg8[%c0_142, %c0_143, %c0_144, %c0_145] : memref<1x2x8x128xf32, #tpu.memory_space<vmem>>, vector<1x2x8x128xf32>
    %298 = vector.shape_cast %297 : vector<1x2x8x128xf32> to vector<2x8x128xf32>
    %299 = vector.shape_cast %296 : vector<2x8x128xf32> to vector<1x2x8x128xf32>
    tpu.vector_store %arg8[%c0_142, %c0_143, %c0_144, %c0_145], %299 {strides = array<i32>} : memref<1x2x8x128xf32, #tpu.memory_space<vmem>>, vector<1x2x8x128xf32>,
    return
  }
  func.func @transform_0(%arg0: i32) -> (i32, i32, i32, i32) {
    %c0_i32 = arith.constant 0 : i32
    %c0_i32_0 = arith.constant 0 : i32
    %c0_i32_1 = arith.constant 0 : i32
    %c0_i32_2 = arith.constant 0 : i32
    return %arg0, %c0_i32, %c0_i32_0, %c0_i32_1 : i32, i32, i32, i32
  }
  func.func @transform_1(%arg0: i32) -> (i32, i32, i32, i32) {
    %c0_i32 = arith.constant 0 : i32
    %c0_i32_0 = arith.constant 0 : i32
    %c0_i32_1 = arith.constant 0 : i32
    %c0_i32_2 = arith.constant 0 : i32
    %c0_i32_3 = arith.constant 0 : i32
    return %c0_i32, %c0_i32_0, %c0_i32_1, %c0_i32_2 : i32, i32, i32, i32
  }
  func.func @transform_2(%arg0: i32) -> (i32, i32, i32) {
    %c0_i32 = arith.constant 0 : i32
    %c0_i32_0 = arith.constant 0 : i32
    %c0_i32_1 = arith.constant 0 : i32
    %c0_i32_2 = arith.constant 0 : i32
    return %c0_i32, %c0_i32_0, %c0_i32_1 : i32, i32, i32
  }
  func.func @transform_3(%arg0: i32) -> (i32, i32, i32, i32) {
    %c0_i32 = arith.constant 0 : i32
    %c0_i32_0 = arith.constant 0 : i32
    %c0_i32_1 = arith.constant 0 : i32
    %c0_i32_2 = arith.constant 0 : i32
    %c0_i32_3 = arith.constant 0 : i32
    return %c0_i32, %c0_i32_0, %c0_i32_1, %c0_i32_2 : i32, i32, i32, i32
  }
  func.func @transform_4(%arg0: i32) -> (i32, i32, i32) {
    %c0_i32 = arith.constant 0 : i32
    %c0_i32_0 = arith.constant 0 : i32
    %c0_i32_1 = arith.constant 0 : i32
    %c0_i32_2 = arith.constant 0 : i32
    return %c0_i32, %c0_i32_0, %c0_i32_1 : i32, i32, i32
  }
  func.func @transform_5(%arg0: i32) -> (i32, i32, i32, i32) {
    %c0_i32 = arith.constant 0 : i32
    %c0_i32_0 = arith.constant 0 : i32
    %c0_i32_1 = arith.constant 0 : i32
    %c0_i32_2 = arith.constant 0 : i32
    %c0_i32_3 = arith.constant 0 : i32
    return %c0_i32, %c0_i32_0, %c0_i32_1, %c0_i32_2 : i32, i32, i32, i32
  }
  func.func @transform_6(%arg0: i32) -> (i32, i32, i32) {
    %c0_i32 = arith.constant 0 : i32
    %c0_i32_0 = arith.constant 0 : i32
    %c0_i32_1 = arith.constant 0 : i32
    %c0_i32_2 = arith.constant 0 : i32
    return %c0_i32, %c0_i32_0, %c0_i32_1 : i32, i32, i32
  }
  func.func @transform_7(%arg0: i32) -> (i32, i32, i32, i32) {
    %c0_i32 = arith.constant 0 : i32
    %c0_i32_0 = arith.constant 0 : i32
    %c0_i32_1 = arith.constant 0 : i32
    %c0_i32_2 = arith.constant 0 : i32
    return %arg0, %c0_i32, %c0_i32_0, %c0_i32_1 : i32, i32, i32, i32
  }
}

</mosaic_0001>

<bundles_post_ra>
// kernel: net_forward.1
= control target key start
LH: loop header
LB: loop body
LE: loop exit
PB: predicated region body
PF: predicated region fallthrough
CT: control target
= control target key end

     0   :  { %12 = vsyncpa [#allocation3], 0  ;;  %s1872_s0 = inlined_call_operand.vmem [shape: f32[1,4,8,128], index: 0, kind: input, shape index: {}]   ;;  %s1873_s1 = inlined_call_operand.hbm [shape: f32[4,16,8,128], index: 1, kind: input, shape index: {}]   ;;  %s1874_s2 = inlined_call_operand.hbm [shape: f32[16,8,128], index: 2, kind: input, shape index: {}]   ;;  %s1875_s3 = inlined_call_operand.hbm [shape: f32[16,16,8,128], index: 3, kind: input, shape index: {}]   ;;  %s1876_s4 = inlined_call_operand.hbm [shape: f32[16,8,128], index: 4, kind: input, shape index: {}]   ;;  %s1877_s5 = inlined_call_operand.hbm [shape: f32[16,2,8,128], index: 5, kind: input, shape index: {}]   ;;  %s1878_s6 = inlined_call_operand.vmem [shape: f32[2,8,128], index: 6, kind: input, shape index: {}]   ;;  %s1879_s7 = inlined_call_operand.vmem [shape: f32[1,2,8,128], index: 7, kind: output, shape index: {}]  }
   0x1   :  { %13 = vsyncpa [#allocation5], 0 }
   0x2   :  { %14 = vsyncpa [#allocation8], 0  ;;  %s1385_s24 = smov [#allocation4]   ;;  %s1386_s26 = smov [#allocation7]  }
   0x3   :  { %s34_s25 = sshll.u32 %s1385_s24, 4  ;;  %s58_s27 = sshll.u32 %s1386_s26, 4  ;;  %s35_s25 = int_to_ptr.vmem [resolvable:$true] %s34_s25  ;;  %s1432_s27 = int_to_ptr.vmem [resolvable:$true] %s58_s27 }
   0x4   :  { %s1269_s30 = scalar_lea.hbm %s1874_s2, 2048 }
   0x5   :  { %p1270_p0 = scmp.ne.s32.totalorder %s1874_s2, %s1269_s30  ;;  %p1273_p1 = scmp.lt.u32.totalorder %s1269_s30, %s1874_s2 }
   0x7   :  { %p1275_p2 = pnand %p1273_p1, %p1270_p0 }
   0x9   :  { %1278 = shalt.err (!%p1275_p2)
}
   0xa   :  { %s1279_s12 = scalar_lea.vmem %s35_s25, 2048  ;;  %p1284_p4 = scmp.lt.s32.totalorder %s35_s25, %s35_s25 }
   0xb   :  { %p1280_p3 = scmp.ne.s32.totalorder %s35_s25, %s1279_s12  ;;  %p1285_p5 = scmp.lt.s32.totalorder %s1279_s12, %s1279_s12 }
   0xd   :  { %p1286_p6 = por %p1285_p5, %p1284_p4 }
   0xf   :  { %p1287_p7 = pnand %p1286_p6, %p1280_p3 }
  0x11   :  { %1290 = shalt.err (!%p1287_p7)
}
  0x12   :  { %s1387_s13 = smov 128   ;;  %s1388_s14 = smov 8  }
  0x13   :  { %40 = dma.hbm_to_vmem [thread:$0]  %s1874_s2, 2048, %s35_s25, [#allocation5], %s1387_s13, %s1387_s13, %s1388_s14  }
  0x14   :  { %s1291_s19 = scalar_lea.hbm %s1876_s4, 2048 }
  0x15   :  { %p1292_p8 = scmp.ne.s32.totalorder %s1876_s4, %s1291_s19  ;;  %p1295_p9 = scmp.lt.u32.totalorder %s1291_s19, %s1876_s4 }
  0x17   :  { %p1297_p10 = pnand %p1295_p9, %p1292_p8 }
  0x19   :  { %1300 = shalt.err (!%p1297_p10)
}
  0x1a   :  { %s1301_s24 = scalar_lea.vmem %s1432_s27, 2048  ;;  %p1306_p12 = scmp.lt.s32.totalorder %s1432_s27, %s1432_s27 }
  0x1b   :  { %p1302_p11 = scmp.ne.s32.totalorder %s1432_s27, %s1301_s24  ;;  %p1307_p13 = scmp.lt.s32.totalorder %s1301_s24, %s1301_s24 }
  0x1d   :  { %p1308_p0 = por %p1307_p13, %p1306_p12 }
  0x1f   :  { %p1309_p1 = pnand %p1308_p0, %p1302_p11 }
  0x21   :  { %1312 = shalt.err (!%p1309_p1)
}
  0x22   :  { %64 = dma.hbm_to_vmem [thread:$0]  %s1876_s4, 2048, %s1432_s27, [#allocation8], %s1387_s13, %s1387_s13, %s1388_s14  }
  0x23   :  { %s1389_s26 = smov [#allocation2]   ;;  %s1390_s29 = smov [#allocation6]  }
  0x24   :  { %s22_s28 = sshll.u32 %s1389_s26, 4  ;;  %s46_s30 = sshll.u32 %s1390_s29, 4  ;;  %s23_s28 = int_to_ptr.vmem [resolvable:$true] %s22_s28  ;;  %s1469_s30 = int_to_ptr.vmem [resolvable:$true] %s46_s30 }
  0x25   :  { %s1313_s10 = scalar_lea.hbm %s1873_s1, 8192 }
  0x26   :  { %p1314_p2 = scmp.ne.s32.totalorder %s1873_s1, %s1313_s10  ;;  %p1317_p3 = scmp.lt.u32.totalorder %s1313_s10, %s1873_s1 }
  0x28   :  { %p1319_p4 = pnand %p1317_p3, %p1314_p2 }
  0x2a   :  { %1322 = shalt.err (!%p1319_p4)
}
  0x2b   :  { %s1323_s4 = scalar_lea.vmem %s23_s28, 8192  ;;  %p1328_p6 = scmp.lt.s32.totalorder %s23_s28, %s23_s28 }
  0x2c   :  { %p1324_p5 = scmp.ne.s32.totalorder %s23_s28, %s1323_s4  ;;  %p1329_p7 = scmp.lt.s32.totalorder %s1323_s4, %s1323_s4 }
  0x2e   :  { %p1330_p8 = por %p1329_p7, %p1328_p6 }
  0x30   :  { %p1331_p9 = pnand %p1330_p8, %p1324_p5 }
  0x32   :  { %1334 = shalt.err (!%p1331_p9)
}
  0x33   :  { %28 = dma.hbm_to_vmem [thread:$0]  %s1873_s1, 8192, %s23_s28, [#allocation3], %s1387_s13, %s1387_s13, %s1388_s14  }
  0x34   :  { %s1335_s20 = scalar_lea.hbm %s1875_s3, 32768 }
  0x35   :  { %p1336_p10 = scmp.ne.s32.totalorder %s1875_s3, %s1335_s20  ;;  %p1339_p11 = scmp.lt.u32.totalorder %s1335_s20, %s1875_s3 }
  0x37   :  { %p1341_p12 = pnand %p1339_p11, %p1336_p10 }
  0x39   :  { %1344 = shalt.err (!%p1341_p12)
}
  0x3a   :  { %s1345_s2 = scalar_lea.vmem %s1469_s30, 32768  ;;  %p1350_p0 = scmp.lt.s32.totalorder %s1469_s30, %s1469_s30 }
  0x3b   :  { %p1346_p13 = scmp.ne.s32.totalorder %s1469_s30, %s1345_s2  ;;  %p1351_p1 = scmp.lt.s32.totalorder %s1345_s2, %s1345_s2 }
  0x3d   :  { %p1352_p2 = por %p1351_p1, %p1350_p0 }
  0x3f   :  { %p1353_p3 = pnand %p1352_p2, %p1346_p13 }
  0x41   :  { %1356 = shalt.err (!%p1353_p3)
}
  0x42   :  { %52 = dma.hbm_to_vmem [thread:$0]  %s1875_s3, 32768, %s1469_s30, [#allocation5], %s1387_s13, %s1387_s13, %s1388_s14  }
  0x43   :  { %s1391_s26 = smov [#allocation9]   ;;  %s1357_s9 = scalar_lea.hbm %s1877_s5, 4096 }
  0x44   :  { %s70_s28 = sshll.u32 %s1391_s26, 4  ;;  %p1358_p4 = scmp.ne.s32.totalorder %s1877_s5, %s1357_s9  ;;  %s71_s28 = int_to_ptr.vmem [resolvable:$true] %s70_s28 }
  0x45   :  { %p1361_p5 = scmp.lt.u32.totalorder %s1357_s9, %s1877_s5 }
  0x47   :  { %p1363_p6 = pnand %p1361_p5, %p1358_p4 }
  0x49   :  { %1366 = shalt.err (!%p1363_p6)
}
  0x4a   :  { %s1367_s16 = scalar_lea.vmem %s71_s28, 4096  ;;  %p1372_p8 = scmp.lt.s32.totalorder %s71_s28, %s71_s28 }
  0x4b   :  { %p1368_p7 = scmp.ne.s32.totalorder %s71_s28, %s1367_s16  ;;  %p1373_p9 = scmp.lt.s32.totalorder %s1367_s16, %s1367_s16 }
  0x4d   :  { %p1374_p10 = por %p1373_p9, %p1372_p8 }
  0x4f   :  { %p1375_p11 = pnand %p1374_p10, %p1368_p7 }
  0x51   :  { %1378 = shalt.err (!%p1375_p11)
}
  0x52   :  { %76 = dma.hbm_to_vmem [thread:$0]  %s1877_s5, 4096, %s71_s28, [#allocation8], %s1387_s13, %s1387_s13, %s1388_s14  }
  0x53   :  { %1379 = dma.done.wait [#allocation3], 8192  }
  0x54   :  { %1380 = vsyncadd [#allocation3], 4294959104 }
  0x55   :  { %1381 = dma.done.wait [#allocation5], 34816  }
  0x56   :  { %1382 = vsyncadd [#allocation5], 4294932480 }
  0x57   :  { %1383 = dma.done.wait [#allocation8], 6144  }
  0x58   :  { %1384 = vsyncadd [#allocation8], 4294961152  ;;  %v94_v0 = vld [vmem:[%s1872_s0] sm:$0xff]  ;;  %v115_v2 = vld [vmem:[#allocation2 + $0x8] sm:$0xff] }
  0x59   :  { %v114_v1 = vld [vmem:[#allocation2] sm:$0xff]  ;;  %v116_v3 = vld [vmem:[#allocation2 + $0x10] sm:$0xff]  ;;  %v117_v4 = vld [vmem:[#allocation2 + $0x18] sm:$0xff]  ;;  %v131_v22 = vmul.f32 %v115_v2, %v94_v0 }
  0x5a   :  { %v118_v5 = vld [vmem:[#allocation2 + $0x20] sm:$0xff]  ;;  %v119_v6 = vld [vmem:[#allocation2 + $0x28] sm:$0xff]  ;;  %v120_v7 = vld [vmem:[#allocation2 + $0x30] sm:$0xff]  ;;  %v130_v21 = vmul.f32 %v114_v1, %v94_v0  ;;  %v132_v28 = vmul.f32 %v116_v3, %v94_v0  ;;  %v133_v29 = vmul.f32 %v117_v4, %v94_v0 }
  0x5b   :  { %v121_v8 = vld [vmem:[#allocation2 + $0x38] sm:$0xff]  ;;  %v98_v9 = vld [vmem:[#allocation4] sm:$0xff]  ;;  %v99_v10 = vld [vmem:[#allocation4 + $0x8] sm:$0xff]  ;;  %v134_v30 = vmul.f32 %v118_v5, %v94_v0  ;;  %v135_v31 = vmul.f32 %v119_v6, %v94_v0  ;;  %v136_v35 = vmul.f32 %v120_v7, %v94_v0 }
  0x5c   :  { %v122_v11 = vld [vmem:[#allocation2 + $0x40] sm:$0xff]  ;;  %v123_v12 = vld [vmem:[#allocation2 + $0x48] sm:$0xff]  ;;  %v124_v13 = vld [vmem:[#allocation2 + $0x50] sm:$0xff]  ;;  %v137_v36 = vmul.f32 %v121_v8, %v94_v0  ;;  %v146_v50 = vadd.f32 %v130_v21, %v98_v9  ;;  %v147_v51 = vadd.f32 %v131_v22, %v99_v10 }
  0x5d   :  { %v100_v14 = vld [vmem:[#allocation4 + $0x10] sm:$0xff]  ;;  %v101_v15 = vld [vmem:[#allocation4 + $0x18] sm:$0xff]  ;;  %v102_v16 = vld [vmem:[#allocation4 + $0x20] sm:$0xff]  ;;  %v138_v37 = vmul.f32 %v122_v11, %v94_v0  ;;  %v139_v38 = vmul.f32 %v123_v12, %v94_v0  ;;  %v140_v43 = vmul.f32 %v124_v13, %v94_v0 }
  0x5e   :  { %v103_v17 = vld [vmem:[#allocation4 + $0x28] sm:$0xff]  ;;  %v125_v18 = vld [vmem:[#allocation2 + $0x58] sm:$0xff]  ;;  %v126_v19 = vld [vmem:[#allocation2 + $0x60] sm:$0xff]  ;;  %v148_v54 = vadd.f32 %v132_v28, %v100_v14  ;;  %v149_v55 = vadd.f32 %v133_v29, %v101_v15  ;;  %v150_v56 = vadd.f32 %v134_v30, %v102_v16 }
  0x5f   :  { %v127_v20 = vld [vmem:[#allocation2 + $0x68] sm:$0xff]  ;;  %v104_v23 = vld [vmem:[#allocation4 + $0x30] sm:$0xff]  ;;  %v105_v24 = vld [vmem:[#allocation4 + $0x38] sm:$0xff]  ;;  %v141_v44 = vmul.f32 %v125_v18, %v94_v0  ;;  %v142_v45 = vmul.f32 %v126_v19, %v94_v0  ;;  %v151_v57 = vadd.f32 %v135_v31, %v103_v17 }
  0x60   :  { %v106_v25 = vld [vmem:[#allocation4 + $0x40] sm:$0xff]  ;;  %v128_v26 = vld [vmem:[#allocation2 + $0x70] sm:$0xff]  ;;  %v129_v27 = vld [vmem:[#allocation2 + $0x78] sm:$0xff]  ;;  %v143_v46 = vmul.f32 %v127_v20, %v94_v0  ;;  %v152_v61 = vadd.f32 %v136_v35, %v104_v23  ;;  %v153_v62 = vadd.f32 %v137_v36, %v105_v24 }
  0x61   :  { %v107_v32 = vld [vmem:[#allocation4 + $0x48] sm:$0xff]  ;;  %v108_v33 = vld [vmem:[#allocation4 + $0x50] sm:$0xff]  ;;  %v109_v34 = vld [vmem:[#allocation4 + $0x58] sm:$0xff]  ;;  %v144_v48 = vmul.f32 %v128_v26, %v94_v0  ;;  %v145_v49 = vmul.f32 %v129_v27, %v94_v0  ;;  %v154_v63 = vadd.f32 %v138_v37, %v106_v25 }
  0x62   :  { %v95_v39 = vld [vmem:[%s1872_s0 + $0x8] sm:$0xff]  ;;  %v110_v40 = vld [vmem:[#allocation4 + $0x60] sm:$0xff]  ;;  %v112_v42 = vld [vmem:[#allocation4 + $0x70] sm:$0xff]  ;;  %v155_v1 = vadd.f32 %v139_v38, %v107_v32  ;;  %v156_v5 = vadd.f32 %v140_v43, %v108_v33  ;;  %v157_v0 = vadd.f32 %v141_v44, %v109_v34 }
  0x63   :  { %v111_v41 = vld [vmem:[#allocation4 + $0x68] sm:$0xff]  ;;  %v113_v47 = vld [vmem:[#allocation4 + $0x78] sm:$0xff]  ;;  %v163_v52 = vld [vmem:[#allocation2 + $0x80] sm:$0xff]  ;;  %v158_v6 = vadd.f32 %v142_v45, %v110_v40  ;;  %v160_v11 = vadd.f32 %v144_v48, %v112_v42 }
  0x64   :  { %v164_v53 = vld [vmem:[#allocation2 + $0x88] sm:$0xff]  ;;  %v165_v58 = vld [vmem:[#allocation2 + $0x90] sm:$0xff]  ;;  %v166_v59 = vld [vmem:[#allocation2 + $0x98] sm:$0xff]  ;;  %v159_v7 = vadd.f32 %v143_v46, %v111_v41  ;;  %v161_v12 = vadd.f32 %v145_v49, %v113_v47  ;;  %v179_v16 = vmul.f32 %v163_v52, %v95_v39 }
  0x65   :  { %v167_v60 = vld [vmem:[#allocation2 + $0xa0] sm:$0xff]  ;;  %v168_v2 = vld [vmem:[#allocation2 + $0xa8] sm:$0xff]  ;;  %v169_v3 = vld [vmem:[#allocation2 + $0xb0] sm:$0xff]  ;;  %v180_v17 = vmul.f32 %v164_v53, %v95_v39  ;;  %v181_v20 = vmul.f32 %v165_v58, %v95_v39  ;;  %v182_v21 = vmul.f32 %v166_v59, %v95_v39 }
  0x66   :  { %v170_v4 = vld [vmem:[#allocation2 + $0xb8] sm:$0xff]  ;;  %v171_v8 = vld [vmem:[#allocation2 + $0xc0] sm:$0xff]  ;;  %v172_v9 = vld [vmem:[#allocation2 + $0xc8] sm:$0xff]  ;;  %v183_v22 = vmul.f32 %v167_v60, %v95_v39  ;;  %v184_v23 = vmul.f32 %v168_v2, %v95_v39  ;;  %v185_v24 = vmul.f32 %v169_v3, %v95_v39  ;;  %v195_v35 = vadd.f32 %v179_v16, %v146_v50 }
  0x67   :  { %v173_v10 = vld [vmem:[#allocation2 + $0xd0] sm:$0xff]  ;;  %v174_v13 = vld [vmem:[#allocation2 + $0xd8] sm:$0xff]  ;;  %v175_v14 = vld [vmem:[#allocation2 + $0xe0] sm:$0xff]  ;;  %v186_v25 = vmul.f32 %v170_v4, %v95_v39  ;;  %v187_v26 = vmul.f32 %v171_v8, %v95_v39  ;;  %v188_v27 = vmul.f32 %v172_v9, %v95_v39  ;;  %v196_v36 = vadd.f32 %v180_v17, %v147_v51 }
  0x68   :  { %v176_v15 = vld [vmem:[#allocation2 + $0xe8] sm:$0xff]  ;;  %v177_v18 = vld [vmem:[#allocation2 + $0xf0] sm:$0xff]  ;;  %v178_v19 = vld [vmem:[#allocation2 + $0xf8] sm:$0xff]  ;;  %v189_v28 = vmul.f32 %v173_v10, %v95_v39  ;;  %v190_v29 = vmul.f32 %v174_v13, %v95_v39  ;;  %v191_v30 = vmul.f32 %v175_v14, %v95_v39  ;;  %v197_v40 = vadd.f32 %v181_v20, %v148_v54 }
  0x69   :  { %v192_v31 = vmul.f32 %v176_v15, %v95_v39  ;;  %v96_v32 = vld [vmem:[%s1872_s0 + $0x10] sm:$0xff]  ;;  %v193_v33 = vmul.f32 %v177_v18, %v95_v39  ;;  %v194_v34 = vmul.f32 %v178_v19, %v95_v39  ;;  %v212_v37 = vld [vmem:[#allocation2 + $0x100] sm:$0xff]  ;;  %v213_v38 = vld [vmem:[#allocation2 + $0x108] sm:$0xff]  ;;  %v198_v41 = vadd.f32 %v182_v21, %v149_v55 }
  0x6a   :  { %v199_v42 = vadd.f32 %v183_v22, %v150_v56  ;;  %v200_v43 = vadd.f32 %v184_v23, %v151_v57  ;;  %v214_v44 = vld [vmem:[#allocation2 + $0x110] sm:$0xff]  ;;  %v215_v45 = vld [vmem:[#allocation2 + $0x118] sm:$0xff]  ;;  %v216_v46 = vld [vmem:[#allocation2 + $0x120] sm:$0xff]  ;;  %v201_v47 = vadd.f32 %v185_v24, %v152_v61  ;;  %v202_v48 = vadd.f32 %v186_v25, %v153_v62 }
  0x6b   :  { %v203_v49 = vadd.f32 %v187_v26, %v154_v63  ;;  %v204_v52 = vadd.f32 %v188_v27, %v155_v1  ;;  %v217_v53 = vld [vmem:[#allocation2 + $0x128] sm:$0xff]  ;;  %v218_v58 = vld [vmem:[#allocation2 + $0x130] sm:$0xff]  ;;  %v219_v59 = vld [vmem:[#allocation2 + $0x138] sm:$0xff]  ;;  %v205_v60 = vadd.f32 %v189_v28, %v156_v5  ;;  %v206_v39 = vadd.f32 %v190_v29, %v157_v0 }
  0x6c   :  { %v207_v50 = vadd.f32 %v191_v30, %v158_v6  ;;  %v208_v51 = vadd.f32 %v192_v31, %v159_v7  ;;  %v220_v2 = vld [vmem:[#allocation2 + $0x140] sm:$0xff]  ;;  %v221_v3 = vld [vmem:[#allocation2 + $0x148] sm:$0xff]  ;;  %v222_v54 = vld [vmem:[#allocation2 + $0x150] sm:$0xff]  ;;  %v209_v55 = vadd.f32 %v193_v33, %v160_v11  ;;  %v210_v56 = vadd.f32 %v194_v34, %v161_v12 }
  0x6d   :  { %v223_v57 = vld [vmem:[#allocation2 + $0x158] sm:$0xff]  ;;  %v224_v4 = vld [vmem:[#allocation2 + $0x160] sm:$0xff]  ;;  %v225_v8 = vld [vmem:[#allocation2 + $0x168] sm:$0xff]  ;;  %v228_v9 = vmul.f32 %v212_v37, %v96_v32  ;;  %v229_v61 = vmul.f32 %v213_v38, %v96_v32  ;;  %v230_v1 = vmul.f32 %v214_v44, %v96_v32  ;;  %v231_v10 = vmul.f32 %v215_v45, %v96_v32 }
  0x6e   :  { %v226_v62 = vld [vmem:[#allocation2 + $0x170] sm:$0xff]  ;;  %v227_v63 = vld [vmem:[#allocation2 + $0x178] sm:$0xff]  ;;  %v232_v13 = vmul.f32 %v216_v46, %v96_v32  ;;  %v233_v14 = vmul.f32 %v217_v53, %v96_v32  ;;  %v234_v5 = vmul.f32 %v218_v58, %v96_v32  ;;  %v235_v0 = vmul.f32 %v219_v59, %v96_v32  ;;  %v261_v22 = vld [vmem:[#allocation2 + $0x180] sm:$0xff] }
  0x6f   :  { %v236_v6 = vmul.f32 %v220_v2, %v96_v32  ;;  %v237_v7 = vmul.f32 %v221_v3, %v96_v32  ;;  %v238_v15 = vmul.f32 %v222_v54, %v96_v32  ;;  %v239_v16 = vmul.f32 %v223_v57, %v96_v32  ;;  %v97_v12 = vld [vmem:[%s1872_s0 + $0x18] sm:$0xff]  ;;  %v262_v23 = vld [vmem:[#allocation2 + $0x188] sm:$0xff]  ;;  %v263_v28 = vld [vmem:[#allocation2 + $0x190] sm:$0xff] }
  0x70   :  { %v240_v17 = vmul.f32 %v224_v4, %v96_v32  ;;  %v241_v11 = vmul.f32 %v225_v8, %v96_v32  ;;  %v242_v18 = vmul.f32 %v226_v62, %v96_v32  ;;  %v243_v19 = vmul.f32 %v227_v63, %v96_v32  ;;  %v264_v29 = vld [vmem:[#allocation2 + $0x198] sm:$0xff]  ;;  %v265_v30 = vld [vmem:[#allocation2 + $0x1a0] sm:$0xff]  ;;  %v266_v38 = vld [vmem:[#allocation2 + $0x1a8] sm:$0xff] }
  0x71   :  { %v244_v20 = vadd.f32 %v228_v9, %v195_v35  ;;  %v245_v21 = vadd.f32 %v229_v61, %v196_v36  ;;  %v246_v24 = vadd.f32 %v230_v1, %v197_v40  ;;  %v247_v25 = vadd.f32 %v231_v10, %v198_v41  ;;  %v267_v44 = vld [vmem:[#allocation2 + $0x1b0] sm:$0xff]  ;;  %v268_v45 = vld [vmem:[#allocation2 + $0x1b8] sm:$0xff]  ;;  %v269_v53 = vld [vmem:[#allocation2 + $0x1c0] sm:$0xff] }
  0x72   :  { %v248_v26 = vadd.f32 %v232_v13, %v199_v42  ;;  %v249_v27 = vadd.f32 %v233_v14, %v200_v43  ;;  %v250_v31 = vadd.f32 %v234_v5, %v201_v47  ;;  %v251_v33 = vadd.f32 %v235_v0, %v202_v48  ;;  %v270_v58 = vld [vmem:[#allocation2 + $0x1c8] sm:$0xff]  ;;  %v271_v40 = vld [vmem:[#allocation2 + $0x1d0] sm:$0xff]  ;;  %v272_v43 = vld [vmem:[#allocation2 + $0x1d8] sm:$0xff] }
  0x73   :  { %v252_v34 = vadd.f32 %v236_v6, %v203_v49  ;;  %v253_v37 = vadd.f32 %v237_v7, %v204_v52  ;;  %v254_v46 = vadd.f32 %v238_v15, %v205_v60  ;;  %v255_v32 = vadd.f32 %v239_v16, %v206_v39  ;;  %v273_v59 = vld [vmem:[#allocation2 + $0x1e0] sm:$0xff]  ;;  %v274_v2 = vld [vmem:[#allocation2 + $0x1e8] sm:$0xff]  ;;  %v275_v48 = vld [vmem:[#allocation2 + $0x1f0] sm:$0xff] }
  0x74   :  { %v256_v35 = vadd.f32 %v240_v17, %v207_v50  ;;  %v257_v36 = vadd.f32 %v241_v11, %v208_v51  ;;  %v258_v41 = vadd.f32 %v242_v18, %v209_v55  ;;  %v259_v42 = vadd.f32 %v243_v19, %v210_v56  ;;  %v276_v49 = vld [vmem:[#allocation2 + $0x1f8] sm:$0xff]  ;;  %v341_v19 = vld [vmem:[#allocation6] sm:$0xff] }
  0x75   :  { %v277_v3 = vmul.f32 %v261_v22, %v97_v12  ;;  %v278_v47 = vmul.f32 %v262_v23, %v97_v12  ;;  %v279_v52 = vmul.f32 %v263_v28, %v97_v12  ;;  %v280_v54 = vmul.f32 %v264_v29, %v97_v12  ;;  %v342_v22 = vld [vmem:[#allocation6 + $0x8] sm:$0xff] }
  0x76   :  { %v281_v57 = vmul.f32 %v265_v30, %v97_v12  ;;  %v282_v4 = vmul.f32 %v266_v38, %v97_v12  ;;  %v283_v60 = vmul.f32 %v267_v44, %v97_v12  ;;  %v284_v39 = vmul.f32 %v268_v45, %v97_v12  ;;  %v348_v45 = vld [vmem:[#allocation6 + $0x38] sm:$0xff] }
  0x77   :  { %v285_v50 = vmul.f32 %v269_v53, %v97_v12  ;;  %v286_v51 = vmul.f32 %v270_v58, %v97_v12  ;;  %v287_v8 = vmul.f32 %v271_v40, %v97_v12  ;;  %v288_v9 = vmul.f32 %v272_v43, %v97_v12  ;;  %v325_v58 = vld [vmem:[#allocation7] sm:$0xff]  ;;  %v326_v40 = vld [vmem:[#allocation7 + $0x8] sm:$0xff] }
  0x78   :  { %v289_v61 = vmul.f32 %v273_v59, %v97_v12  ;;  %v290_v55 = vmul.f32 %v274_v2, %v97_v12  ;;  %v291_v56 = vmul.f32 %v275_v48, %v97_v12  ;;  %v292_v62 = vmul.f32 %v276_v49, %v97_v12  ;;  %v327_v2 = vld [vmem:[#allocation7 + $0x10] sm:$0xff]  ;;  %v330_v48 = vld [vmem:[#allocation7 + $0x28] sm:$0xff]  ;;  %v352_v49 = vld [vmem:[#allocation6 + $0x58] sm:$0xff] }
  0x79   :  { %v293_v63 = vadd.f32 %v277_v3, %v244_v20  ;;  %v294_v1 = vadd.f32 %v278_v47, %v245_v21  ;;  %v295_v10 = vadd.f32 %v279_v52, %v246_v24  ;;  %v296_v13 = vadd.f32 %v280_v54, %v247_v25  ;;  %v343_v20 = vld [vmem:[#allocation6 + $0x10] sm:$0xff]  ;;  %v344_v21 = vld [vmem:[#allocation6 + $0x18] sm:$0xff]  ;;  %v345_v24 = vld [vmem:[#allocation6 + $0x20] sm:$0xff] }
  0x7a   :  { %v297_v14 = vadd.f32 %v281_v57, %v248_v26  ;;  %v298_v5 = vadd.f32 %v282_v4, %v249_v27  ;;  %v299_v0 = vadd.f32 %v283_v60, %v250_v31  ;;  %v300_v6 = vadd.f32 %v284_v39, %v251_v33  ;;  %v346_v31 = vld [vmem:[#allocation6 + $0x28] sm:$0xff]  ;;  %v347_v33 = vld [vmem:[#allocation6 + $0x30] sm:$0xff]  ;;  %v328_v3 = vld [vmem:[#allocation7 + $0x18] sm:$0xff] }
  0x7b   :  { %v301_v7 = vadd.f32 %v285_v50, %v252_v34  ;;  %v302_v15 = vadd.f32 %v286_v51, %v253_v37  ;;  %v303_v16 = vadd.f32 %v287_v8, %v254_v46  ;;  %v304_v17 = vadd.f32 %v288_v9, %v255_v32  ;;  %v349_v46 = vld [vmem:[#allocation6 + $0x40] sm:$0xff]  ;;  %v354_v54 = vld [vmem:[#allocation6 + $0x68] sm:$0xff]  ;;  %v331_v60 = vld [vmem:[#allocation7 + $0x30] sm:$0xff] }
  0x7c   :  { %v305_v11 = vadd.f32 %v289_v61, %v256_v35  ;;  %v306_v18 = vadd.f32 %v290_v55, %v257_v36  ;;  %v307_v23 = vadd.f32 %v291_v56, %v258_v41  ;;  %v308_v28 = vadd.f32 %v292_v62, %v259_v42  ;;  %v350_v41 = vld [vmem:[#allocation6 + $0x48] sm:$0xff]  ;;  %v351_v42 = vld [vmem:[#allocation6 + $0x50] sm:$0xff]  ;;  %v329_v47 = vld [vmem:[#allocation7 + $0x20] sm:$0xff] }
  0x7d   :  { %v309_v29 = vmax.f32 %v293_v63, 0.0  ;;  %v1533_v12 = vmax.f32 %v294_v1, 0.0  ;;  %v1535_v25 = vmax.f32 %v295_v10, 0.0  ;;  %v1537_v26 = vmax.f32 %v296_v13, 0.0  ;;  %v353_v52 = vld [vmem:[#allocation6 + $0x60] sm:$0xff]  ;;  %v332_v39 = vld [vmem:[#allocation7 + $0x38] sm:$0xff] }
  0x7e   :  { %v1539_v27 = vmax.f32 %v297_v14, 0.0  ;;  %v1541_v30 = vmax.f32 %v298_v5, 0.0  ;;  %v1543_v34 = vmax.f32 %v299_v0, 0.0  ;;  %v1545_v37 = vmax.f32 %v300_v6, 0.0  ;;  %v333_v50 = vld [vmem:[#allocation7 + $0x40] sm:$0xff]  ;;  %v355_v51 = vld [vmem:[#allocation6 + $0x70] sm:$0xff] }
  0x7f   :  { %v1547_v38 = vmax.f32 %v301_v7, 0.0  ;;  %v1549_v44 = vmax.f32 %v302_v15, 0.0  ;;  %v1551_v32 = vmax.f32 %v303_v16, 0.0  ;;  %v1553_v35 = vmax.f32 %v304_v17, 0.0  ;;  %v356_v8 = vld [vmem:[#allocation6 + $0x78] sm:$0xff]  ;;  %v334_v62 = vld [vmem:[#allocation7 + $0x48] sm:$0xff] }
  0x80   :  { %v1555_v36 = vmax.f32 %v305_v11, 0.0  ;;  %v1557_v53 = vmax.f32 %v306_v18, 0.0  ;;  %v1559_v43 = vmax.f32 %v307_v23, 0.0  ;;  %v1561_v59 = vmax.f32 %v308_v28, 0.0  ;;  %v335_v63 = vld [vmem:[#allocation7 + $0x50] sm:$0xff]  ;;  %v336_v1 = vld [vmem:[#allocation7 + $0x58] sm:$0xff] }
  0x81   :  { %v357_v57 = vmul.f32 %v341_v19, %v309_v29  ;;  %v358_v4 = vmul.f32 %v342_v22, %v309_v29  ;;  %v359_v9 = vmul.f32 %v343_v20, %v309_v29  ;;  %v360_v61 = vmul.f32 %v344_v21, %v309_v29  ;;  %v337_v0 = vld [vmem:[#allocation7 + $0x60] sm:$0xff]  ;;  %v338_v6 = vld [vmem:[#allocation7 + $0x68] sm:$0xff]  ;;  %v339_v7 = vld [vmem:[#allocation7 + $0x70] sm:$0xff] }
  0x82   :  { %1884 = vst [vmem:[#allocation13_spill] sm:$0xff] %v1555_v36  ;;  %1885 = vst [vmem:[#allocation14_spill] sm:$0xff] %v1557_v53  ;;  %v361_v55 = vmul.f32 %v345_v24, %v309_v29  ;;  %v362_v56 = vmul.f32 %v346_v31, %v309_v29  ;;  %v363_v10 = vmul.f32 %v347_v33, %v309_v29  ;;  %v340_v18 = vld [vmem:[#allocation7 + $0x78] sm:$0xff]  ;;  %v390_v20 = vld [vmem:[#allocation6 + $0x80] sm:$0xff] }
  0x83   :  { %1886 = vst [vmem:[#allocation15_spill] sm:$0xff] %v1559_v43  ;;  %1887 = vst [vmem:[#allocation16_spill] sm:$0xff] %v1561_v59  ;;  %v364_v13 = vmul.f32 %v348_v45, %v309_v29  ;;  %v365_v14 = vmul.f32 %v349_v46, %v309_v29  ;;  %v366_v5 = vmul.f32 %v350_v41, %v309_v29  ;;  %v391_v21 = vld [vmem:[#allocation6 + $0x88] sm:$0xff]  ;;  %v392_v46 = vld [vmem:[#allocation6 + $0x90] sm:$0xff] }
  0x84   :  { %v367_v15 = vmul.f32 %v351_v42, %v309_v29  ;;  %v368_v16 = vmul.f32 %v352_v49, %v309_v29  ;;  %v369_v17 = vmul.f32 %v353_v52, %v309_v29  ;;  %v370_v11 = vmul.f32 %v354_v54, %v309_v29  ;;  %v393_v41 = vld [vmem:[#allocation6 + $0x98] sm:$0xff]  ;;  %v394_v59 = vld [vmem:[#allocation6 + $0xa0] sm:$0xff]  ;;  %v395_v52 = vld [vmem:[#allocation6 + $0xa8] sm:$0xff] }
  0x85   :  { %v371_v19 = vmul.f32 %v355_v51, %v309_v29  ;;  %v372_v22 = vmul.f32 %v356_v8, %v309_v29  ;;  %v373_v23 = vadd.f32 %v357_v57, %v325_v58  ;;  %v374_v28 = vadd.f32 %v358_v4, %v326_v40  ;;  %v396_v54 = vld [vmem:[#allocation6 + $0xb0] sm:$0xff]  ;;  %v397_v36 = vld [vmem:[#allocation6 + $0xb8] sm:$0xff]  ;;  %v398_v57 = vld [vmem:[#allocation6 + $0xc0] sm:$0xff] }
  0x86   :  { %v375_v24 = vadd.f32 %v359_v9, %v327_v2  ;;  %v376_v31 = vadd.f32 %v360_v61, %v328_v3  ;;  %v377_v33 = vadd.f32 %v361_v55, %v329_v47  ;;  %v378_v45 = vadd.f32 %v362_v56, %v330_v48  ;;  %v399_v4 = vld [vmem:[#allocation6 + $0xc8] sm:$0xff]  ;;  %v400_v2 = vld [vmem:[#allocation6 + $0xd0] sm:$0xff]  ;;  %v401_v48 = vld [vmem:[#allocation6 + $0xd8] sm:$0xff] }
  0x87   :  { %v379_v43 = vadd.f32 %v363_v10, %v331_v60  ;;  %v380_v53 = vadd.f32 %v364_v13, %v332_v39  ;;  %v381_v42 = vadd.f32 %v365_v14, %v333_v50  ;;  %v382_v49 = vadd.f32 %v366_v5, %v334_v62  ;;  %v402_v8 = vld [vmem:[#allocation6 + $0xe0] sm:$0xff]  ;;  %v403_v9 = vld [vmem:[#allocation6 + $0xe8] sm:$0xff]  ;;  %v404_v50 = vld [vmem:[#allocation6 + $0xf0] sm:$0xff] }
  0x88   :  { %v383_v51 = vadd.f32 %v367_v15, %v335_v63  ;;  %v384_v29 = vadd.f32 %v368_v16, %v336_v1  ;;  %v385_v58 = vadd.f32 %v369_v17, %v337_v0  ;;  %v386_v40 = vadd.f32 %v370_v11, %v338_v6  ;;  %v405_v61 = vld [vmem:[#allocation6 + $0xf8] sm:$0xff]  ;;  %v439_v11 = vld [vmem:[#allocation6 + $0x100] sm:$0xff] }
  0x89   :  { %v387_v3 = vadd.f32 %v371_v19, %v339_v7  ;;  %v388_v47 = vadd.f32 %v372_v22, %v340_v18  ;;  %v406_v60 = vmul.f32 %v390_v20, %v1533_v12  ;;  %v407_v39 = vmul.f32 %v391_v21, %v1533_v12  ;;  %v441_v21 = vld [vmem:[#allocation6 + $0x110] sm:$0xff] }
  0x8a   :  { %v408_v55 = vmul.f32 %v392_v46, %v1533_v12  ;;  %v409_v56 = vmul.f32 %v393_v41, %v1533_v12  ;;  %v410_v62 = vmul.f32 %v394_v59, %v1533_v12  ;;  %v411_v63 = vmul.f32 %v395_v52, %v1533_v12  ;;  %v442_v46 = vld [vmem:[#allocation6 + $0x118] sm:$0xff]  ;;  %v443_v41 = vld [vmem:[#allocation6 + $0x120] sm:$0xff] }
  0x8b   :  { %v412_v1 = vmul.f32 %v396_v54, %v1533_v12  ;;  %v413_v10 = vmul.f32 %v397_v36, %v1533_v12  ;;  %v414_v13 = vmul.f32 %v398_v57, %v1533_v12  ;;  %v415_v14 = vmul.f32 %v399_v4, %v1533_v12  ;;  %v440_v36 = vld [vmem:[#allocation6 + $0x108] sm:$0xff] }
  0x8c   :  { %v416_v5 = vmul.f32 %v400_v2, %v1533_v12  ;;  %v417_v0 = vmul.f32 %v401_v48, %v1533_v12  ;;  %v418_v6 = vmul.f32 %v402_v8, %v1533_v12  ;;  %v419_v7 = vmul.f32 %v403_v9, %v1533_v12  ;;  %v444_v2 = vld [vmem:[#allocation6 + $0x128] sm:$0xff]  ;;  %v445_v48 = vld [vmem:[#allocation6 + $0x130] sm:$0xff]  ;;  %v446_v8 = vld [vmem:[#allocation6 + $0x138] sm:$0xff] }
  0x8d   :  { %v420_v59 = vmul.f32 %v404_v50, %v1533_v12  ;;  %v421_v15 = vmul.f32 %v405_v61, %v1533_v12  ;;  %v422_v16 = vadd.f32 %v406_v60, %v373_v23  ;;  %v423_v17 = vadd.f32 %v407_v39, %v374_v28  ;;  %v447_v60 = vld [vmem:[#allocation6 + $0x140] sm:$0xff]  ;;  %v448_v39 = vld [vmem:[#allocation6 + $0x148] sm:$0xff] }
  0x8e   :  { %v424_v18 = vadd.f32 %v408_v55, %v375_v24  ;;  %v425_v19 = vadd.f32 %v409_v56, %v376_v31  ;;  %v426_v22 = vadd.f32 %v410_v62, %v377_v33  ;;  %v427_v20 = vadd.f32 %v411_v63, %v378_v45  ;;  %v449_v24 = vld [vmem:[#allocation6 + $0x150] sm:$0xff]  ;;  %v450_v45 = vld [vmem:[#allocation6 + $0x158] sm:$0xff]  ;;  %v451_v50 = vld [vmem:[#allocation6 + $0x160] sm:$0xff] }
  0x8f   :  { %v428_v52 = vadd.f32 %v412_v1, %v379_v43  ;;  %v429_v54 = vadd.f32 %v413_v10, %v380_v53  ;;  %v430_v57 = vadd.f32 %v414_v13, %v381_v42  ;;  %v431_v4 = vadd.f32 %v415_v14, %v382_v49  ;;  %v452_v61 = vld [vmem:[#allocation6 + $0x168] sm:$0xff]  ;;  %v453_v42 = vld [vmem:[#allocation6 + $0x170] sm:$0xff]  ;;  %v454_v49 = vld [vmem:[#allocation6 + $0x178] sm:$0xff] }
  0x90   :  { %v432_v9 = vadd.f32 %v416_v5, %v383_v51  ;;  %v433_v12 = vadd.f32 %v417_v0, %v384_v29  ;;  %v434_v23 = vadd.f32 %v418_v6, %v385_v58  ;;  %v435_v28 = vadd.f32 %v419_v7, %v386_v40  ;;  %v488_v6 = vld [vmem:[#allocation6 + $0x180] sm:$0xff]  ;;  %v489_v7 = vld [vmem:[#allocation6 + $0x188] sm:$0xff] }
  0x91   :  { %v436_v31 = vadd.f32 %v420_v59, %v387_v3  ;;  %v437_v33 = vadd.f32 %v421_v15, %v388_v47  ;;  %v455_v43 = vmul.f32 %v439_v11, %v1535_v25  ;;  %v456_v53 = vmul.f32 %v440_v36, %v1535_v25 }
  0x92   :  { %v457_v55 = vmul.f32 %v441_v21, %v1535_v25  ;;  %v458_v51 = vmul.f32 %v442_v46, %v1535_v25  ;;  %v459_v29 = vmul.f32 %v443_v41, %v1535_v25  ;;  %v460_v58 = vmul.f32 %v444_v2, %v1535_v25  ;;  %v490_v21 = vld [vmem:[#allocation6 + $0x190] sm:$0xff]  ;;  %v491_v46 = vld [vmem:[#allocation6 + $0x198] sm:$0xff]  ;;  %v492_v41 = vld [vmem:[#allocation6 + $0x1a0] sm:$0xff] }
  0x93   :  { %v461_v40 = vmul.f32 %v445_v48, %v1535_v25  ;;  %v462_v3 = vmul.f32 %v446_v8, %v1535_v25  ;;  %v463_v47 = vmul.f32 %v447_v60, %v1535_v25  ;;  %v464_v56 = vmul.f32 %v448_v39, %v1535_v25  ;;  %v493_v39 = vld [vmem:[#allocation6 + $0x1a8] sm:$0xff] }
  0x94   :  { %v465_v62 = vmul.f32 %v449_v24, %v1535_v25  ;;  %v466_v63 = vmul.f32 %v450_v45, %v1535_v25  ;;  %v467_v1 = vmul.f32 %v451_v50, %v1535_v25  ;;  %v468_v10 = vmul.f32 %v452_v61, %v1535_v25  ;;  %v494_v24 = vld [vmem:[#allocation6 + $0x1b0] sm:$0xff]  ;;  %v495_v45 = vld [vmem:[#allocation6 + $0x1b8] sm:$0xff]  ;;  %v496_v61 = vld [vmem:[#allocation6 + $0x1c0] sm:$0xff] }
  0x95   :  { %v469_v13 = vmul.f32 %v453_v42, %v1535_v25  ;;  %v470_v14 = vmul.f32 %v454_v49, %v1535_v25  ;;  %v471_v5 = vadd.f32 %v455_v43, %v422_v16  ;;  %v472_v0 = vadd.f32 %v456_v53, %v423_v17  ;;  %v497_v43 = vld [vmem:[#allocation6 + $0x1c8] sm:$0xff]  ;;  %v500_v53 = vld [vmem:[#allocation6 + $0x1e0] sm:$0xff] }
  0x96   :  { %v473_v59 = vadd.f32 %v457_v55, %v424_v18  ;;  %v474_v15 = vadd.f32 %v458_v51, %v425_v19  ;;  %v475_v11 = vadd.f32 %v459_v29, %v426_v22  ;;  %v476_v36 = vadd.f32 %v460_v58, %v427_v20  ;;  %v498_v18 = vld [vmem:[#allocation6 + $0x1d0] sm:$0xff]  ;;  %v499_v20 = vld [vmem:[#allocation6 + $0x1d8] sm:$0xff]  ;;  %v501_v42 = vld [vmem:[#allocation6 + $0x1e8] sm:$0xff] }
  0x97   :  { %v477_v2 = vadd.f32 %v461_v40, %v428_v52  ;;  %v478_v48 = vadd.f32 %v462_v3, %v429_v54  ;;  %v479_v8 = vadd.f32 %v463_v47, %v430_v57  ;;  %v480_v60 = vadd.f32 %v464_v56, %v431_v4  ;;  %v502_v57 = vld [vmem:[#allocation6 + $0x1f0] sm:$0xff]  ;;  %v503_v4 = vld [vmem:[#allocation6 + $0x1f8] sm:$0xff] }
  0x98   :  { %v481_v50 = vadd.f32 %v465_v62, %v432_v9  ;;  %v482_v25 = vadd.f32 %v466_v63, %v433_v12  ;;  %v483_v16 = vadd.f32 %v467_v1, %v434_v23  ;;  %v484_v17 = vadd.f32 %v468_v10, %v435_v28  ;;  %v537_v63 = vld [vmem:[#allocation6 + $0x200] sm:$0xff]  ;;  %v538_v1 = vld [vmem:[#allocation6 + $0x208] sm:$0xff] }
  0x99   :  { %v485_v19 = vadd.f32 %v469_v13, %v436_v31  ;;  %v486_v22 = vadd.f32 %v470_v14, %v437_v33  ;;  %v504_v52 = vmul.f32 %v488_v6, %v1537_v26  ;;  %v505_v54 = vmul.f32 %v489_v7, %v1537_v26  ;;  %v539_v7 = vld [vmem:[#allocation6 + $0x210] sm:$0xff] }
  0x9a   :  { %v506_v49 = vmul.f32 %v490_v21, %v1537_v26  ;;  %v507_v9 = vmul.f32 %v491_v46, %v1537_v26  ;;  %v508_v12 = vmul.f32 %v492_v41, %v1537_v26  ;;  %v509_v23 = vmul.f32 %v493_v39, %v1537_v26  ;;  %v540_v21 = vld [vmem:[#allocation6 + $0x218] sm:$0xff]  ;;  %v541_v46 = vld [vmem:[#allocation6 + $0x220] sm:$0xff] }
  0x9b   :  { %v510_v28 = vmul.f32 %v494_v24, %v1537_v26  ;;  %v511_v31 = vmul.f32 %v495_v45, %v1537_v26  ;;  %v512_v33 = vmul.f32 %v496_v61, %v1537_v26  ;;  %v513_v55 = vmul.f32 %v497_v43, %v1537_v26  ;;  %v542_v61 = vld [vmem:[#allocation6 + $0x228] sm:$0xff]  ;;  %v543_v43 = vld [vmem:[#allocation6 + $0x230] sm:$0xff] }
  0x9c   :  { %v514_v51 = vmul.f32 %v498_v18, %v1537_v26  ;;  %v515_v29 = vmul.f32 %v499_v20, %v1537_v26  ;;  %v516_v58 = vmul.f32 %v500_v53, %v1537_v26  ;;  %v517_v40 = vmul.f32 %v501_v42, %v1537_v26  ;;  %v544_v18 = vld [vmem:[#allocation6 + $0x238] sm:$0xff]  ;;  %v545_v53 = vld [vmem:[#allocation6 + $0x240] sm:$0xff]  ;;  %v546_v42 = vld [vmem:[#allocation6 + $0x248] sm:$0xff] }
  0x9d   :  { %v518_v3 = vmul.f32 %v502_v57, %v1537_v26  ;;  %v519_v47 = vmul.f32 %v503_v4, %v1537_v26  ;;  %v520_v56 = vadd.f32 %v504_v52, %v471_v5  ;;  %v521_v62 = vadd.f32 %v505_v54, %v472_v0  ;;  %v549_v52 = vld [vmem:[#allocation6 + $0x260] sm:$0xff]  ;;  %v550_v54 = vld [vmem:[#allocation6 + $0x268] sm:$0xff] }
  0x9e   :  { %v522_v10 = vadd.f32 %v506_v49, %v473_v59  ;;  %v523_v13 = vadd.f32 %v507_v9, %v474_v15  ;;  %v524_v14 = vadd.f32 %v508_v12, %v475_v11  ;;  %v525_v6 = vadd.f32 %v509_v23, %v476_v36  ;;  %v547_v59 = vld [vmem:[#allocation6 + $0x250] sm:$0xff]  ;;  %v548_v36 = vld [vmem:[#allocation6 + $0x258] sm:$0xff] }
  0x9f   :  { %v526_v41 = vadd.f32 %v510_v28, %v477_v2  ;;  %v527_v39 = vadd.f32 %v511_v31, %v478_v48  ;;  %v528_v24 = vadd.f32 %v512_v33, %v479_v8  ;;  %v529_v45 = vadd.f32 %v513_v55, %v480_v60  ;;  %v551_v8 = vld [vmem:[#allocation6 + $0x270] sm:$0xff]  ;;  %v552_v60 = vld [vmem:[#allocation6 + $0x278] sm:$0xff] }
  0xa0   :  { %v530_v20 = vadd.f32 %v514_v51, %v481_v50  ;;  %v531_v26 = vadd.f32 %v515_v29, %v482_v25  ;;  %v532_v5 = vadd.f32 %v516_v58, %v483_v16  ;;  %v533_v0 = vadd.f32 %v517_v40, %v484_v17  ;;  %v586_v51 = vld [vmem:[#allocation6 + $0x280] sm:$0xff]  ;;  %v587_v29 = vld [vmem:[#allocation6 + $0x288] sm:$0xff] }
  0xa1   :  { %v534_v15 = vadd.f32 %v518_v3, %v485_v19  ;;  %v535_v11 = vadd.f32 %v519_v47, %v486_v22  ;;  %v553_v2 = vmul.f32 %v537_v63, %v1539_v27  ;;  %v554_v48 = vmul.f32 %v538_v1, %v1539_v27  ;;  %v588_v63 = vld [vmem:[#allocation6 + $0x290] sm:$0xff]  ;;  %v589_v1 = vld [vmem:[#allocation6 + $0x298] sm:$0xff] }
  0xa2   :  { %v555_v57 = vmul.f32 %v539_v7, %v1539_v27  ;;  %v556_v50 = vmul.f32 %v540_v21, %v1539_v27  ;;  %v557_v25 = vmul.f32 %v541_v46, %v1539_v27  ;;  %v558_v16 = vmul.f32 %v542_v61, %v1539_v27  ;;  %v590_v7 = vld [vmem:[#allocation6 + $0x2a0] sm:$0xff] }
  0xa3   :  { %v559_v17 = vmul.f32 %v543_v43, %v1539_v27  ;;  %v560_v19 = vmul.f32 %v544_v18, %v1539_v27  ;;  %v561_v22 = vmul.f32 %v545_v53, %v1539_v27  ;;  %v562_v4 = vmul.f32 %v546_v42, %v1539_v27  ;;  %v591_v18 = vld [vmem:[#allocation6 + $0x2a8] sm:$0xff]  ;;  %v592_v53 = vld [vmem:[#allocation6 + $0x2b0] sm:$0xff]  ;;  %v593_v42 = vld [vmem:[#allocation6 + $0x2b8] sm:$0xff] }
  0xa4   :  { %v563_v49 = vmul.f32 %v547_v59, %v1539_v27  ;;  %v564_v9 = vmul.f32 %v548_v36, %v1539_v27  ;;  %v565_v12 = vmul.f32 %v549_v52, %v1539_v27  ;;  %v566_v23 = vmul.f32 %v550_v54, %v1539_v27  ;;  %v594_v36 = vld [vmem:[#allocation6 + $0x2c0] sm:$0xff]  ;;  %v595_v52 = vld [vmem:[#allocation6 + $0x2c8] sm:$0xff] }
  0xa5   :  { %v567_v28 = vmul.f32 %v551_v8, %v1539_v27  ;;  %v568_v31 = vmul.f32 %v552_v60, %v1539_v27  ;;  %v569_v33 = vadd.f32 %v553_v2, %v520_v56  ;;  %v570_v55 = vadd.f32 %v554_v48, %v521_v62  ;;  %v598_v54 = vld [vmem:[#allocation6 + $0x2e0] sm:$0xff]  ;;  %v599_v2 = vld [vmem:[#allocation6 + $0x2e8] sm:$0xff] }
  0xa6   :  { %v571_v58 = vadd.f32 %v555_v57, %v522_v10  ;;  %v572_v40 = vadd.f32 %v556_v50, %v523_v13  ;;  %v573_v3 = vadd.f32 %v557_v25, %v524_v14  ;;  %v574_v47 = vadd.f32 %v558_v16, %v525_v6  ;;  %v596_v10 = vld [vmem:[#allocation6 + $0x2d0] sm:$0xff]  ;;  %v597_v6 = vld [vmem:[#allocation6 + $0x2d8] sm:$0xff] }
  0xa7   :  { %v575_v21 = vadd.f32 %v559_v17, %v526_v41  ;;  %v576_v46 = vadd.f32 %v560_v19, %v527_v39  ;;  %v577_v61 = vadd.f32 %v561_v22, %v528_v24  ;;  %v578_v43 = vadd.f32 %v562_v4, %v529_v45  ;;  %v600_v24 = vld [vmem:[#allocation6 + $0x2f0] sm:$0xff]  ;;  %v601_v45 = vld [vmem:[#allocation6 + $0x2f8] sm:$0xff]  ;;  %v635_v4 = vld [vmem:[#allocation6 + $0x300] sm:$0xff] }
  0xa8   :  { %v579_v59 = vadd.f32 %v563_v49, %v530_v20  ;;  %v580_v27 = vadd.f32 %v564_v9, %v531_v26  ;;  %v581_v56 = vadd.f32 %v565_v12, %v532_v5  ;;  %v582_v62 = vadd.f32 %v566_v23, %v533_v0  ;;  %v636_v49 = vld [vmem:[#allocation6 + $0x308] sm:$0xff] }
  0xa9   :  { %v583_v13 = vadd.f32 %v567_v28, %v534_v15  ;;  %v584_v14 = vadd.f32 %v568_v31, %v535_v11  ;;  %v602_v41 = vmul.f32 %v586_v51, %v1541_v30  ;;  %v603_v39 = vmul.f32 %v587_v29, %v1541_v30  ;;  %v637_v31 = vld [vmem:[#allocation6 + $0x310] sm:$0xff]  ;;  %v638_v51 = vld [vmem:[#allocation6 + $0x318] sm:$0xff]  ;;  %v639_v29 = vld [vmem:[#allocation6 + $0x320] sm:$0xff] }
  0xaa   :  { %v604_v48 = vmul.f32 %v588_v63, %v1541_v30  ;;  %v605_v20 = vmul.f32 %v589_v1, %v1541_v30  ;;  %v606_v26 = vmul.f32 %v590_v7, %v1541_v30  ;;  %v607_v5 = vmul.f32 %v591_v18, %v1541_v30 }
  0xab   :  { %v608_v0 = vmul.f32 %v592_v53, %v1541_v30  ;;  %v609_v15 = vmul.f32 %v593_v42, %v1541_v30  ;;  %v610_v11 = vmul.f32 %v594_v36, %v1541_v30  ;;  %v611_v8 = vmul.f32 %v595_v52, %v1541_v30  ;;  %v640_v53 = vld [vmem:[#allocation6 + $0x328] sm:$0xff]  ;;  %v641_v42 = vld [vmem:[#allocation6 + $0x330] sm:$0xff]  ;;  %v642_v36 = vld [vmem:[#allocation6 + $0x338] sm:$0xff] }
  0xac   :  { %v612_v60 = vmul.f32 %v596_v10, %v1541_v30  ;;  %v613_v57 = vmul.f32 %v597_v6, %v1541_v30  ;;  %v614_v50 = vmul.f32 %v598_v54, %v1541_v30  ;;  %v615_v25 = vmul.f32 %v599_v2, %v1541_v30  ;;  %v643_v10 = vld [vmem:[#allocation6 + $0x340] sm:$0xff]  ;;  %v644_v6 = vld [vmem:[#allocation6 + $0x348] sm:$0xff] }
  0xad   :  { %v616_v16 = vmul.f32 %v600_v24, %v1541_v30  ;;  %v617_v17 = vmul.f32 %v601_v45, %v1541_v30  ;;  %v618_v19 = vadd.f32 %v602_v41, %v569_v33  ;;  %v619_v22 = vadd.f32 %v603_v39, %v570_v55  ;;  %v647_v54 = vld [vmem:[#allocation6 + $0x360] sm:$0xff]  ;;  %v648_v2 = vld [vmem:[#allocation6 + $0x368] sm:$0xff] }
  0xae   :  { %v620_v9 = vadd.f32 %v604_v48, %v571_v58  ;;  %v621_v12 = vadd.f32 %v605_v20, %v572_v40  ;;  %v622_v23 = vadd.f32 %v606_v26, %v573_v3  ;;  %v623_v28 = vadd.f32 %v607_v5, %v574_v47  ;;  %v645_v58 = vld [vmem:[#allocation6 + $0x350] sm:$0xff]  ;;  %v646_v47 = vld [vmem:[#allocation6 + $0x358] sm:$0xff] }
  0xaf   :  { %v624_v63 = vadd.f32 %v608_v0, %v575_v21  ;;  %v625_v1 = vadd.f32 %v609_v15, %v576_v46  ;;  %v626_v7 = vadd.f32 %v610_v11, %v577_v61  ;;  %v627_v18 = vadd.f32 %v611_v8, %v578_v43  ;;  %v649_v61 = vld [vmem:[#allocation6 + $0x370] sm:$0xff]  ;;  %v650_v43 = vld [vmem:[#allocation6 + $0x378] sm:$0xff]  ;;  %v684_v11 = vld [vmem:[#allocation6 + $0x380] sm:$0xff] }
  0xb0   :  { %v628_v52 = vadd.f32 %v612_v60, %v579_v59  ;;  %v629_v30 = vadd.f32 %v613_v57, %v580_v27  ;;  %v630_v33 = vadd.f32 %v614_v50, %v581_v56  ;;  %v631_v55 = vadd.f32 %v615_v25, %v582_v62  ;;  %v685_v8 = vld [vmem:[#allocation6 + $0x388] sm:$0xff] }
  0xb1   :  { %v632_v40 = vadd.f32 %v616_v16, %v583_v13  ;;  %v633_v3 = vadd.f32 %v617_v17, %v584_v14  ;;  %v651_v21 = vmul.f32 %v635_v4, %v1543_v34  ;;  %v652_v46 = vmul.f32 %v636_v49, %v1543_v34  ;;  %v686_v16 = vld [vmem:[#allocation6 + $0x390] sm:$0xff]  ;;  %v687_v17 = vld [vmem:[#allocation6 + $0x398] sm:$0xff]  ;;  %v688_v4 = vld [vmem:[#allocation6 + $0x3a0] sm:$0xff] }
  0xb2   :  { %v653_v41 = vmul.f32 %v637_v31, %v1543_v34  ;;  %v654_v59 = vmul.f32 %v638_v51, %v1543_v34  ;;  %v655_v27 = vmul.f32 %v639_v29, %v1543_v34  ;;  %v656_v56 = vmul.f32 %v640_v53, %v1543_v34  ;;  %v689_v53 = vld [vmem:[#allocation6 + $0x3a8] sm:$0xff] }
  0xb3   :  { %v657_v62 = vmul.f32 %v641_v42, %v1543_v34  ;;  %v658_v13 = vmul.f32 %v642_v36, %v1543_v34  ;;  %v659_v14 = vmul.f32 %v643_v10, %v1543_v34  ;;  %v660_v39 = vmul.f32 %v644_v6, %v1543_v34  ;;  %v690_v42 = vld [vmem:[#allocation6 + $0x3b0] sm:$0xff]  ;;  %v691_v36 = vld [vmem:[#allocation6 + $0x3b8] sm:$0xff]  ;;  %v692_v6 = vld [vmem:[#allocation6 + $0x3c0] sm:$0xff] }
  0xb4   :  { %v661_v24 = vmul.f32 %v645_v58, %v1543_v34  ;;  %v662_v45 = vmul.f32 %v646_v47, %v1543_v34  ;;  %v663_v48 = vmul.f32 %v647_v54, %v1543_v34  ;;  %v664_v20 = vmul.f32 %v648_v2, %v1543_v34  ;;  %v693_v58 = vld [vmem:[#allocation6 + $0x3c8] sm:$0xff]  ;;  %v696_v47 = vld [vmem:[#allocation6 + $0x3e0] sm:$0xff] }
  0xb5   :  { %v665_v26 = vmul.f32 %v649_v61, %v1543_v34  ;;  %v666_v5 = vmul.f32 %v650_v43, %v1543_v34  ;;  %v667_v0 = vadd.f32 %v651_v21, %v618_v19  ;;  %v668_v15 = vadd.f32 %v652_v46, %v619_v22  ;;  %v697_v54 = vld [vmem:[#allocation6 + $0x3e8] sm:$0xff] }
  0xb6   :  { %v669_v60 = vadd.f32 %v653_v41, %v620_v9  ;;  %v670_v57 = vadd.f32 %v654_v59, %v621_v12  ;;  %v671_v50 = vadd.f32 %v655_v27, %v622_v23  ;;  %v672_v25 = vadd.f32 %v656_v56, %v623_v28  ;;  %v694_v9 = vld [vmem:[#allocation6 + $0x3d0] sm:$0xff]  ;;  %v695_v28 = vld [vmem:[#allocation6 + $0x3d8] sm:$0xff] }
  0xb7   :  { %v673_v49 = vadd.f32 %v657_v62, %v624_v63  ;;  %v674_v31 = vadd.f32 %v658_v13, %v625_v1  ;;  %v675_v51 = vadd.f32 %v659_v14, %v626_v7  ;;  %v676_v29 = vadd.f32 %v660_v39, %v627_v18  ;;  %v698_v7 = vld [vmem:[#allocation6 + $0x3f0] sm:$0xff]  ;;  %v699_v18 = vld [vmem:[#allocation6 + $0x3f8] sm:$0xff]  ;;  %v733_v13 = vld [vmem:[#allocation6 + $0x400] sm:$0xff] }
  0xb8   :  { %v677_v10 = vadd.f32 %v661_v24, %v628_v52  ;;  %v678_v34 = vadd.f32 %v662_v45, %v629_v30  ;;  %v679_v19 = vadd.f32 %v663_v48, %v630_v33  ;;  %v680_v22 = vadd.f32 %v664_v20, %v631_v55  ;;  %v734_v14 = vld [vmem:[#allocation6 + $0x408] sm:$0xff]  ;;  %v735_v20 = vld [vmem:[#allocation6 + $0x410] sm:$0xff] }
  0xb9   :  { %v681_v12 = vadd.f32 %v665_v26, %v632_v40  ;;  %v682_v23 = vadd.f32 %v666_v5, %v633_v3  ;;  %v700_v63 = vmul.f32 %v684_v11, %v1545_v37  ;;  %v701_v1 = vmul.f32 %v685_v8, %v1545_v37  ;;  %v736_v26 = vld [vmem:[#allocation6 + $0x418] sm:$0xff]  ;;  %v737_v5 = vld [vmem:[#allocation6 + $0x420] sm:$0xff] }
  0xba   :  { %v702_v2 = vmul.f32 %v686_v16, %v1545_v37  ;;  %v703_v52 = vmul.f32 %v687_v17, %v1545_v37  ;;  %v704_v30 = vmul.f32 %v688_v4, %v1545_v37  ;;  %v705_v33 = vmul.f32 %v689_v53, %v1545_v37  ;;  %v738_v4 = vld [vmem:[#allocation6 + $0x428] sm:$0xff]  ;;  %v739_v53 = vld [vmem:[#allocation6 + $0x430] sm:$0xff] }
  0xbb   :  { %v706_v55 = vmul.f32 %v690_v42, %v1545_v37  ;;  %v707_v40 = vmul.f32 %v691_v36, %v1545_v37  ;;  %v708_v3 = vmul.f32 %v692_v6, %v1545_v37  ;;  %v709_v21 = vmul.f32 %v693_v58, %v1545_v37  ;;  %v740_v42 = vld [vmem:[#allocation6 + $0x438] sm:$0xff]  ;;  %v741_v6 = vld [vmem:[#allocation6 + $0x440] sm:$0xff]  ;;  %v742_v58 = vld [vmem:[#allocation6 + $0x448] sm:$0xff] }
  0xbc   :  { %v710_v46 = vmul.f32 %v694_v9, %v1545_v37  ;;  %v711_v61 = vmul.f32 %v695_v28, %v1545_v37  ;;  %v712_v43 = vmul.f32 %v696_v47, %v1545_v37  ;;  %v713_v41 = vmul.f32 %v697_v54, %v1545_v37  ;;  %v745_v9 = vld [vmem:[#allocation6 + $0x460] sm:$0xff]  ;;  %v746_v28 = vld [vmem:[#allocation6 + $0x468] sm:$0xff] }
  0xbd   :  { %v714_v59 = vmul.f32 %v698_v7, %v1545_v37  ;;  %v715_v27 = vmul.f32 %v699_v18, %v1545_v37  ;;  %v716_v56 = vadd.f32 %v700_v63, %v667_v0  ;;  %v717_v62 = vadd.f32 %v701_v1, %v668_v15 }
  0xbe   :  { %v718_v39 = vadd.f32 %v702_v2, %v669_v60  ;;  %v719_v24 = vadd.f32 %v703_v52, %v670_v57  ;;  %v720_v45 = vadd.f32 %v704_v30, %v671_v50  ;;  %v721_v48 = vadd.f32 %v705_v33, %v672_v25  ;;  %v743_v60 = vld [vmem:[#allocation6 + $0x450] sm:$0xff]  ;;  %v744_v25 = vld [vmem:[#allocation6 + $0x458] sm:$0xff] }
  0xbf   :  { %v722_v11 = vadd.f32 %v706_v55, %v673_v49  ;;  %v723_v8 = vadd.f32 %v707_v40, %v674_v31  ;;  %v724_v16 = vadd.f32 %v708_v3, %v675_v51  ;;  %v725_v17 = vadd.f32 %v709_v21, %v676_v29  ;;  %v747_v51 = vld [vmem:[#allocation6 + $0x470] sm:$0xff]  ;;  %v748_v29 = vld [vmem:[#allocation6 + $0x478] sm:$0xff]  ;;  %v782_v55 = vld [vmem:[#allocation6 + $0x480] sm:$0xff] }
  0xc0   :  { %v726_v36 = vadd.f32 %v710_v46, %v677_v10  ;;  %v727_v37 = vadd.f32 %v711_v61, %v678_v34  ;;  %v728_v0 = vadd.f32 %v712_v43, %v679_v19  ;;  %v729_v15 = vadd.f32 %v713_v41, %v680_v22  ;;  %v783_v40 = vld [vmem:[#allocation6 + $0x488] sm:$0xff]  ;;  %v784_v43 = vld [vmem:[#allocation6 + $0x490] sm:$0xff]  ;;  %v785_v41 = vld [vmem:[#allocation6 + $0x498] sm:$0xff] }
  0xc1   :  { %v730_v57 = vadd.f32 %v714_v59, %v681_v12  ;;  %v731_v50 = vadd.f32 %v715_v27, %v682_v23  ;;  %v749_v49 = vmul.f32 %v733_v13, %v1547_v38  ;;  %v750_v31 = vmul.f32 %v734_v14, %v1547_v38  ;;  %v786_v59 = vld [vmem:[#allocation6 + $0x4a0] sm:$0xff] }
  0xc2   :  { %v751_v47 = vmul.f32 %v735_v20, %v1547_v38  ;;  %v752_v10 = vmul.f32 %v736_v26, %v1547_v38  ;;  %v753_v34 = vmul.f32 %v737_v5, %v1547_v38  ;;  %v754_v19 = vmul.f32 %v738_v4, %v1547_v38  ;;  %v787_v26 = vld [vmem:[#allocation6 + $0x4a8] sm:$0xff]  ;;  %v788_v5 = vld [vmem:[#allocation6 + $0x4b0] sm:$0xff]  ;;  %v789_v4 = vld [vmem:[#allocation6 + $0x4b8] sm:$0xff] }
  0xc3   :  { %v755_v22 = vmul.f32 %v739_v53, %v1547_v38  ;;  %v756_v12 = vmul.f32 %v740_v42, %v1547_v38  ;;  %v757_v23 = vmul.f32 %v741_v6, %v1547_v38  ;;  %v758_v54 = vmul.f32 %v742_v58, %v1547_v38  ;;  %v790_v42 = vld [vmem:[#allocation6 + $0x4c0] sm:$0xff]  ;;  %v791_v6 = vld [vmem:[#allocation6 + $0x4c8] sm:$0xff] }
  0xc4   :  { %v759_v63 = vmul.f32 %v743_v60, %v1547_v38  ;;  %v760_v1 = vmul.f32 %v744_v25, %v1547_v38  ;;  %v761_v7 = vmul.f32 %v745_v9, %v1547_v38  ;;  %v762_v18 = vmul.f32 %v746_v28, %v1547_v38  ;;  %v794_v58 = vld [vmem:[#allocation6 + $0x4e0] sm:$0xff]  ;;  %v795_v60 = vld [vmem:[#allocation6 + $0x4e8] sm:$0xff] }
  0xc5   :  { %v763_v2 = vmul.f32 %v747_v51, %v1547_v38  ;;  %v764_v52 = vmul.f32 %v748_v29, %v1547_v38  ;;  %v765_v30 = vadd.f32 %v749_v49, %v716_v56  ;;  %v766_v33 = vadd.f32 %v750_v31, %v717_v62 }
  0xc6   :  { %v767_v3 = vadd.f32 %v751_v47, %v718_v39  ;;  %v768_v21 = vadd.f32 %v752_v10, %v719_v24  ;;  %v769_v46 = vadd.f32 %v753_v34, %v720_v45  ;;  %v770_v61 = vadd.f32 %v754_v19, %v721_v48  ;;  %v792_v39 = vld [vmem:[#allocation6 + $0x4d0] sm:$0xff]  ;;  %v793_v48 = vld [vmem:[#allocation6 + $0x4d8] sm:$0xff]  ;;  %v831_v19 = vld [vmem:[#allocation6 + $0x500] sm:$0xff] }
  0xc7   :  { %v771_v27 = vadd.f32 %v755_v22, %v722_v11  ;;  %v772_v13 = vadd.f32 %v756_v12, %v723_v8  ;;  %v773_v14 = vadd.f32 %v757_v23, %v724_v16  ;;  %v774_v20 = vadd.f32 %v758_v54, %v725_v17  ;;  %v796_v16 = vld [vmem:[#allocation6 + $0x4f0] sm:$0xff]  ;;  %v797_v17 = vld [vmem:[#allocation6 + $0x4f8] sm:$0xff]  ;;  %v832_v22 = vld [vmem:[#allocation6 + $0x508] sm:$0xff] }
  0xc8   :  { %v775_v53 = vadd.f32 %v759_v63, %v726_v36  ;;  %v776_v38 = vadd.f32 %v760_v1, %v727_v37  ;;  %v777_v56 = vadd.f32 %v761_v7, %v728_v0  ;;  %v778_v62 = vadd.f32 %v762_v18, %v729_v15  ;;  %v833_v1 = vld [vmem:[#allocation6 + $0x510] sm:$0xff]  ;;  %v834_v7 = vld [vmem:[#allocation6 + $0x518] sm:$0xff]  ;;  %v835_v18 = vld [vmem:[#allocation6 + $0x520] sm:$0xff] }
  0xc9   :  { %v779_v24 = vadd.f32 %v763_v2, %v730_v57  ;;  %v780_v45 = vadd.f32 %v764_v52, %v731_v50  ;;  %v798_v11 = vmul.f32 %v782_v55, %v1549_v44  ;;  %v799_v8 = vmul.f32 %v783_v40, %v1549_v44 }
  0xca   :  { %v800_v25 = vmul.f32 %v784_v43, %v1549_v44  ;;  %v801_v36 = vmul.f32 %v785_v41, %v1549_v44  ;;  %v802_v37 = vmul.f32 %v786_v59, %v1549_v44  ;;  %v803_v0 = vmul.f32 %v787_v26, %v1549_v44  ;;  %v836_v43 = vld [vmem:[#allocation6 + $0x528] sm:$0xff]  ;;  %v837_v41 = vld [vmem:[#allocation6 + $0x530] sm:$0xff]  ;;  %v838_v59 = vld [vmem:[#allocation6 + $0x538] sm:$0xff] }
  0xcb   :  { %v804_v15 = vmul.f32 %v788_v5, %v1549_v44  ;;  %v805_v57 = vmul.f32 %v789_v4, %v1549_v44  ;;  %v806_v50 = vmul.f32 %v790_v42, %v1549_v44  ;;  %v807_v9 = vmul.f32 %v791_v6, %v1549_v44  ;;  %v839_v5 = vld [vmem:[#allocation6 + $0x540] sm:$0xff]  ;;  %v840_v4 = vld [vmem:[#allocation6 + $0x548] sm:$0xff] }
  0xcc   :  { %v808_v28 = vmul.f32 %v792_v39, %v1549_v44  ;;  %v809_v49 = vmul.f32 %v793_v48, %v1549_v44  ;;  %v810_v31 = vmul.f32 %v794_v58, %v1549_v44  ;;  %v811_v51 = vmul.f32 %v795_v60, %v1549_v44  ;;  %v843_v42 = vld [vmem:[#allocation6 + $0x560] sm:$0xff]  ;;  %v844_v6 = vld [vmem:[#allocation6 + $0x568] sm:$0xff] }
  0xcd   :  { %v812_v29 = vmul.f32 %v796_v16, %v1549_v44  ;;  %v813_v47 = vmul.f32 %v797_v17, %v1549_v44  ;;  %v814_v10 = vadd.f32 %v798_v11, %v765_v30  ;;  %v815_v34 = vadd.f32 %v799_v8, %v766_v33 }
  0xce   :  { %v816_v12 = vadd.f32 %v800_v25, %v767_v3  ;;  %v817_v23 = vadd.f32 %v801_v36, %v768_v21  ;;  %v818_v54 = vadd.f32 %v802_v37, %v769_v46  ;;  %v819_v63 = vadd.f32 %v803_v0, %v770_v61  ;;  %v841_v3 = vld [vmem:[#allocation6 + $0x550] sm:$0xff]  ;;  %v842_v61 = vld [vmem:[#allocation6 + $0x558] sm:$0xff]  ;;  %v880_v37 = vld [vmem:[#allocation6 + $0x580] sm:$0xff] }
  0xcf   :  { %v820_v2 = vadd.f32 %v804_v15, %v771_v27  ;;  %v821_v52 = vadd.f32 %v805_v57, %v772_v13  ;;  %v822_v55 = vadd.f32 %v806_v50, %v773_v14  ;;  %v823_v40 = vadd.f32 %v807_v9, %v774_v20  ;;  %v845_v14 = vld [vmem:[#allocation6 + $0x570] sm:$0xff]  ;;  %v846_v20 = vld [vmem:[#allocation6 + $0x578] sm:$0xff]  ;;  %v881_v0 = vld [vmem:[#allocation6 + $0x588] sm:$0xff] }
  0xd0   :  { %v824_v26 = vadd.f32 %v808_v28, %v775_v53  ;;  %v825_v44 = vadd.f32 %v809_v49, %v776_v38  ;;  %v826_v30 = vadd.f32 %v810_v31, %v777_v56  ;;  %v827_v33 = vadd.f32 %v811_v51, %v778_v62  ;;  %v882_v28 = vld [vmem:[#allocation6 + $0x590] sm:$0xff]  ;;  %v883_v49 = vld [vmem:[#allocation6 + $0x598] sm:$0xff]  ;;  %v884_v31 = vld [vmem:[#allocation6 + $0x5a0] sm:$0xff] }
  0xd1   :  { %v828_v21 = vadd.f32 %v812_v29, %v779_v24  ;;  %v829_v46 = vadd.f32 %v813_v47, %v780_v45  ;;  %v847_v27 = vmul.f32 %v831_v19, %v1551_v32  ;;  %v848_v13 = vmul.f32 %v832_v22, %v1551_v32  ;;  %v885_v22 = vld [vmem:[#allocation6 + $0x5a8] sm:$0xff] }
  0xd2   :  { %v849_v39 = vmul.f32 %v833_v1, %v1551_v32  ;;  %v850_v53 = vmul.f32 %v834_v7, %v1551_v32  ;;  %v851_v38 = vmul.f32 %v835_v18, %v1551_v32  ;;  %v852_v56 = vmul.f32 %v836_v43, %v1551_v32  ;;  %v886_v1 = vld [vmem:[#allocation6 + $0x5b0] sm:$0xff]  ;;  %v887_v7 = vld [vmem:[#allocation6 + $0x5b8] sm:$0xff]  ;;  %v888_v43 = vld [vmem:[#allocation6 + $0x5c0] sm:$0xff] }
  0xd3   :  { %v853_v62 = vmul.f32 %v837_v41, %v1551_v32  ;;  %v854_v24 = vmul.f32 %v838_v59, %v1551_v32  ;;  %v855_v45 = vmul.f32 %v839_v5, %v1551_v32  ;;  %v856_v48 = vmul.f32 %v840_v4, %v1551_v32  ;;  %v889_v41 = vld [vmem:[#allocation6 + $0x5c8] sm:$0xff]  ;;  %v892_v59 = vld [vmem:[#allocation6 + $0x5e0] sm:$0xff] }
  0xd4   :  { %v857_v58 = vmul.f32 %v841_v3, %v1551_v32  ;;  %v858_v60 = vmul.f32 %v842_v61, %v1551_v32  ;;  %v859_v11 = vmul.f32 %v843_v42, %v1551_v32  ;;  %v860_v8 = vmul.f32 %v844_v6, %v1551_v32  ;;  %v893_v5 = vld [vmem:[#allocation6 + $0x5e8] sm:$0xff] }
  0xd5   :  { %v861_v16 = vmul.f32 %v845_v14, %v1551_v32  ;;  %v862_v17 = vmul.f32 %v846_v20, %v1551_v32  ;;  %v863_v25 = vadd.f32 %v847_v27, %v814_v10  ;;  %v864_v36 = vadd.f32 %v848_v13, %v815_v34 }
  0xd6   :  { %v865_v15 = vadd.f32 %v849_v39, %v816_v12  ;;  %v866_v57 = vadd.f32 %v850_v53, %v817_v23  ;;  %v867_v50 = vadd.f32 %v851_v38, %v818_v54  ;;  %v868_v9 = vadd.f32 %v852_v56, %v819_v63  ;;  %v890_v12 = vld [vmem:[#allocation6 + $0x5d0] sm:$0xff]  ;;  %v891_v63 = vld [vmem:[#allocation6 + $0x5d8] sm:$0xff]  ;;  %v929_v53 = vld [vmem:[#allocation6 + $0x600] sm:$0xff] }
  0xd7   :  { %v869_v51 = vadd.f32 %v853_v62, %v820_v2  ;;  %v870_v29 = vadd.f32 %v854_v24, %v821_v52  ;;  %v871_v47 = vadd.f32 %v855_v45, %v822_v55  ;;  %v872_v19 = vadd.f32 %v856_v48, %v823_v40  ;;  %v894_v55 = vld [vmem:[#allocation6 + $0x5f0] sm:$0xff]  ;;  %v895_v40 = vld [vmem:[#allocation6 + $0x5f8] sm:$0xff]  ;;  %v930_v38 = vld [vmem:[#allocation6 + $0x608] sm:$0xff] }
  0xd8   :  { %v873_v18 = vadd.f32 %v857_v58, %v824_v26  ;;  %v874_v32 = vadd.f32 %v858_v60, %v825_v44  ;;  %v875_v10 = vadd.f32 %v859_v11, %v826_v30  ;;  %v876_v34 = vadd.f32 %v860_v8, %v827_v33  ;;  %v931_v48 = vld [vmem:[#allocation6 + $0x610] sm:$0xff]  ;;  %v932_v58 = vld [vmem:[#allocation6 + $0x618] sm:$0xff]  ;;  %v933_v60 = vld [vmem:[#allocation6 + $0x620] sm:$0xff] }
  0xd9   :  { %v877_v23 = vadd.f32 %v861_v16, %v828_v21  ;;  %v878_v54 = vadd.f32 %v862_v17, %v829_v46  ;;  %v896_v2 = vmul.f32 %v880_v37, %v1553_v35  ;;  %v897_v52 = vmul.f32 %v881_v0, %v1553_v35  ;;  %v934_v37 = vld [vmem:[#allocation6 + $0x628] sm:$0xff]  ;;  %v935_v0 = vld [vmem:[#allocation6 + $0x630] sm:$0xff] }
  0xda   :  { %v898_v4 = vmul.f32 %v882_v28, %v1553_v35  ;;  %v899_v26 = vmul.f32 %v883_v49, %v1553_v35  ;;  %v900_v44 = vmul.f32 %v884_v31, %v1553_v35  ;;  %v901_v30 = vmul.f32 %v885_v22, %v1553_v35  ;;  %v936_v28 = vld [vmem:[#allocation6 + $0x638] sm:$0xff]  ;;  %v937_v31 = vld [vmem:[#allocation6 + $0x640] sm:$0xff]  ;;  %v938_v22 = vld [vmem:[#allocation6 + $0x648] sm:$0xff] }
  0xdb   :  { %v902_v33 = vmul.f32 %v886_v1, %v1553_v35  ;;  %v903_v3 = vmul.f32 %v887_v7, %v1553_v35  ;;  %v904_v21 = vmul.f32 %v888_v43, %v1553_v35  ;;  %v905_v46 = vmul.f32 %v889_v41, %v1553_v35  ;;  %v941_v1 = vld [vmem:[#allocation6 + $0x660] sm:$0xff]  ;;  %v942_v7 = vld [vmem:[#allocation6 + $0x668] sm:$0xff] }
  0xdc   :  { %v906_v61 = vmul.f32 %v890_v12, %v1553_v35  ;;  %v907_v42 = vmul.f32 %v891_v63, %v1553_v35  ;;  %v908_v6 = vmul.f32 %v892_v59, %v1553_v35  ;;  %v909_v27 = vmul.f32 %v893_v5, %v1553_v35  ;;  %v1888_v43 = vld [vmem:[#allocation13_spill] sm:$0xff] }
  0xdd   :  { %v910_v13 = vmul.f32 %v894_v55, %v1553_v35  ;;  %v911_v14 = vmul.f32 %v895_v40, %v1553_v35  ;;  %v912_v20 = vadd.f32 %v896_v2, %v863_v25  ;;  %v913_v39 = vadd.f32 %v897_v52, %v864_v36 }
  0xde   :  { %v914_v56 = vadd.f32 %v898_v4, %v865_v15  ;;  %v915_v62 = vadd.f32 %v899_v26, %v866_v57  ;;  %v916_v24 = vadd.f32 %v900_v44, %v867_v50  ;;  %v917_v45 = vadd.f32 %v901_v30, %v868_v9  ;;  %v939_v15 = vld [vmem:[#allocation6 + $0x650] sm:$0xff]  ;;  %v940_v9 = vld [vmem:[#allocation6 + $0x658] sm:$0xff]  ;;  %v978_v26 = vld [vmem:[#allocation6 + $0x680] sm:$0xff] }
  0xdf   :  { %v918_v11 = vadd.f32 %v902_v33, %v869_v51  ;;  %v919_v8 = vadd.f32 %v903_v3, %v870_v29  ;;  %v920_v16 = vadd.f32 %v904_v21, %v871_v47  ;;  %v921_v17 = vadd.f32 %v905_v46, %v872_v19  ;;  %v943_v47 = vld [vmem:[#allocation6 + $0x670] sm:$0xff]  ;;  %v944_v19 = vld [vmem:[#allocation6 + $0x678] sm:$0xff]  ;;  %v979_v44 = vld [vmem:[#allocation6 + $0x688] sm:$0xff] }
  0xe0   :  { %v922_v49 = vadd.f32 %v906_v61, %v873_v18  ;;  %v923_v35 = vadd.f32 %v907_v42, %v874_v32  ;;  %v924_v25 = vadd.f32 %v908_v6, %v875_v10  ;;  %v925_v36 = vadd.f32 %v909_v27, %v876_v34  ;;  %v980_v46 = vld [vmem:[#allocation6 + $0x690] sm:$0xff]  ;;  %v981_v61 = vld [vmem:[#allocation6 + $0x698] sm:$0xff] }
  0xe1   :  { %v926_v57 = vadd.f32 %v910_v13, %v877_v23  ;;  %v927_v50 = vadd.f32 %v911_v14, %v878_v54  ;;  %v945_v51 = vmul.f32 %v929_v53, %v1888_v43  ;;  %v946_v29 = vmul.f32 %v930_v38, %v1888_v43  ;;  %v982_v14 = vld [vmem:[#allocation6 + $0x6a0] sm:$0xff]  ;;  %v983_v53 = vld [vmem:[#allocation6 + $0x6a8] sm:$0xff]  ;;  %v984_v38 = vld [vmem:[#allocation6 + $0x6b0] sm:$0xff] }
  0xe2   :  { %v947_v41 = vmul.f32 %v931_v48, %v1888_v43  ;;  %v948_v18 = vmul.f32 %v932_v58, %v1888_v43  ;;  %v949_v32 = vmul.f32 %v933_v60, %v1888_v43  ;;  %v950_v10 = vmul.f32 %v934_v37, %v1888_v43  ;;  %v987_v60 = vld [vmem:[#allocation6 + $0x6c8] sm:$0xff]  ;;  %v1027_v37 = vld [vmem:[#allocation6 + $0x700] sm:$0xff] }
  0xe3   :  { %v951_v34 = vmul.f32 %v935_v0, %v1888_v43  ;;  %v952_v12 = vmul.f32 %v936_v28, %v1888_v43  ;;  %v953_v23 = vmul.f32 %v937_v31, %v1888_v43  ;;  %v954_v54 = vmul.f32 %v938_v22, %v1888_v43  ;;  %v1028_v0 = vld [vmem:[#allocation6 + $0x708] sm:$0xff]  ;;  %v989_v28 = vld [vmem:[#allocation6 + $0x6d8] sm:$0xff] }
  0xe4   :  { %v955_v63 = vmul.f32 %v939_v15, %v1888_v43  ;;  %v956_v59 = vmul.f32 %v940_v9, %v1888_v43  ;;  %v957_v5 = vmul.f32 %v941_v1, %v1888_v43  ;;  %v958_v2 = vmul.f32 %v942_v7, %v1888_v43  ;;  %v993_v9 = vld [vmem:[#allocation6 + $0x6f8] sm:$0xff] }
  0xe5   :  { %v959_v52 = vmul.f32 %v943_v47, %v1888_v43  ;;  %v960_v55 = vmul.f32 %v944_v19, %v1888_v43  ;;  %v961_v40 = vadd.f32 %v945_v51, %v912_v20  ;;  %v962_v4 = vadd.f32 %v946_v29, %v913_v39  ;;  %v985_v20 = vld [vmem:[#allocation6 + $0x6b8] sm:$0xff]  ;;  %v986_v39 = vld [vmem:[#allocation6 + $0x6c0] sm:$0xff]  ;;  %v1029_v43 = vld [vmem:[#allocation6 + $0x710] sm:$0xff] }
  0xe6   :  { %v963_v30 = vadd.f32 %v947_v41, %v914_v56  ;;  %v964_v33 = vadd.f32 %v948_v18, %v915_v62  ;;  %v965_v3 = vadd.f32 %v949_v32, %v916_v24  ;;  %v966_v21 = vadd.f32 %v950_v10, %v917_v45  ;;  %v1889_v56 = vld [vmem:[#allocation14_spill] sm:$0xff]  ;;  %v1030_v47 = vld [vmem:[#allocation6 + $0x718] sm:$0xff]  ;;  %v1890_v19 = vld [vmem:[#allocation15_spill] sm:$0xff] }
  0xe7   :  { %v967_v42 = vadd.f32 %v951_v34, %v918_v11  ;;  %v968_v6 = vadd.f32 %v952_v12, %v919_v8  ;;  %v969_v27 = vadd.f32 %v953_v23, %v920_v16  ;;  %v1755_v13 = vadd.f32 %v954_v54, %v921_v17  ;;  %v988_v17 = vld [vmem:[#allocation6 + $0x6d0] sm:$0xff]  ;;  %v1076_v23 = vld [vmem:[#allocation6 + $0x780] sm:$0xff]  ;;  %v1077_v54 = vld [vmem:[#allocation6 + $0x788] sm:$0xff] }
  0xe8   :  { %v971_v48 = vadd.f32 %v955_v63, %v922_v49  ;;  %v1757_v58 = vadd.f32 %v956_v59, %v923_v35  ;;  %v994_v62 = vmul.f32 %v978_v26, %v1889_v56  ;;  %v995_v24 = vmul.f32 %v979_v44, %v1889_v56  ;;  %v990_v49 = vld [vmem:[#allocation6 + $0x6e0] sm:$0xff]  ;;  %v991_v35 = vld [vmem:[#allocation6 + $0x6e8] sm:$0xff]  ;;  %v1078_v44 = vld [vmem:[#allocation6 + $0x790] sm:$0xff] }
  0xe9   :  { %v1761_v45 = vadd.f32 %v957_v5, %v924_v25  ;;  %v1763_v11 = vadd.f32 %v958_v2, %v925_v36  ;;  %v1765_v8 = vadd.f32 %v959_v52, %v926_v57  ;;  %v1767_v16 = vadd.f32 %v960_v55, %v927_v50  ;;  %v992_v36 = vld [vmem:[#allocation6 + $0x6f0] sm:$0xff]  ;;  %v1031_v2 = vld [vmem:[#allocation6 + $0x720] sm:$0xff] }
  0xea   :  { %v996_v31 = vmul.f32 %v980_v46, %v1889_v56  ;;  %v997_v22 = vmul.f32 %v981_v61, %v1889_v56  ;;  %v998_v15 = vmul.f32 %v982_v14, %v1889_v56  ;;  %v999_v25 = vmul.f32 %v983_v53, %v1889_v56  ;;  %v1032_v46 = vld [vmem:[#allocation6 + $0x728] sm:$0xff]  ;;  %v1079_v53 = vld [vmem:[#allocation6 + $0x798] sm:$0xff] }
  0xeb   :  { %v1000_v57 = vmul.f32 %v984_v38, %v1889_v56  ;;  %v1001_v50 = vmul.f32 %v985_v20, %v1889_v56  ;;  %v1002_v1 = vmul.f32 %v986_v39, %v1889_v56  ;;  %v1003_v7 = vmul.f32 %v987_v60, %v1889_v56  ;;  %v1891_v38 = vld [vmem:[#allocation16_spill] sm:$0xff] }
  0xec   :  { %v1010_v51 = vadd.f32 %v994_v62, %v961_v40  ;;  %v1011_v29 = vadd.f32 %v995_v24, %v962_v4  ;;  %v1043_v41 = vmul.f32 %v1027_v37, %v1890_v19  ;;  %v1044_v18 = vmul.f32 %v1028_v0, %v1890_v19 }
  0xed   :  { %v1004_v32 = vmul.f32 %v988_v17, %v1889_v56  ;;  %v1005_v10 = vmul.f32 %v989_v28, %v1889_v56  ;;  %v1006_v34 = vmul.f32 %v990_v49, %v1889_v56  ;;  %v1007_v12 = vmul.f32 %v991_v35, %v1889_v56  ;;  %v1080_v17 = vld [vmem:[#allocation6 + $0x7a0] sm:$0xff]  ;;  %v1034_v28 = vld [vmem:[#allocation6 + $0x738] sm:$0xff]  ;;  %v1036_v35 = vld [vmem:[#allocation6 + $0x748] sm:$0xff] }
  0xee   :  { %v1008_v63 = vmul.f32 %v992_v36, %v1889_v56  ;;  %v1009_v59 = vmul.f32 %v993_v9, %v1889_v56  ;;  %v1012_v5 = vadd.f32 %v996_v31, %v963_v30  ;;  %v1045_v52 = vmul.f32 %v1029_v43, %v1890_v19  ;;  %v1081_v31 = vld [vmem:[#allocation6 + $0x7a8] sm:$0xff]  ;;  %v1038_v36 = vld [vmem:[#allocation6 + $0x758] sm:$0xff]  ;;  %v1082_v43 = vld [vmem:[#allocation6 + $0x7b0] sm:$0xff] }
  0xef   :  { %v1013_v55 = vadd.f32 %v997_v22, %v964_v33  ;;  %v1014_v40 = vadd.f32 %v998_v15, %v965_v3  ;;  %v1015_v4 = vadd.f32 %v999_v25, %v966_v21  ;;  %v1046_v26 = vmul.f32 %v1030_v47, %v1890_v19  ;;  %v1033_v21 = vld [vmem:[#allocation6 + $0x730] sm:$0xff]  ;;  %v1042_v47 = vld [vmem:[#allocation6 + $0x778] sm:$0xff] }
  0xf0   :  { %v1059_v61 = vadd.f32 %v1043_v41, %v1010_v51  ;;  %v1060_v14 = vadd.f32 %v1044_v18, %v1011_v29  ;;  %v1092_v20 = vmul.f32 %v1076_v23, %v1891_v38  ;;  %v1093_v39 = vmul.f32 %v1077_v54, %v1891_v38  ;;  %v1037_v25 = vld [vmem:[#allocation6 + $0x750] sm:$0xff]  ;;  %v1040_v29 = vld [vmem:[#allocation6 + $0x768] sm:$0xff] }
  0xf1   :  { %v1016_v60 = vadd.f32 %v1000_v57, %v967_v42  ;;  %v1017_v56 = vadd.f32 %v1001_v50, %v968_v6  ;;  %v1789_v30 = vadd.f32 %v1002_v1, %v969_v27  ;;  %v1047_v62 = vmul.f32 %v1031_v2, %v1890_v19  ;;  %v1035_v42 = vld [vmem:[#allocation6 + $0x740] sm:$0xff] }
  0xf2   :  { %v1793_v33 = vadd.f32 %v1003_v7, %v1755_v13  ;;  %v1795_v3 = vadd.f32 %v1004_v32, %v971_v48  ;;  %v1061_v24 = vadd.f32 %v1045_v52, %v1012_v5  ;;  %v1094_v37 = vmul.f32 %v1078_v44, %v1891_v38  ;;  %v1039_v1 = vld [vmem:[#allocation6 + $0x760] sm:$0xff] }
  0xf3   :  { %v1799_v0 = vadd.f32 %v1005_v10, %v1757_v58  ;;  %v1048_v6 = vmul.f32 %v1032_v46, %v1890_v19  ;;  %v1062_v27 = vadd.f32 %v1046_v26, %v1013_v55  ;;  %v1095_v49 = vmul.f32 %v1079_v53, %v1891_v38  ;;  %v1143_v55 = vld [vmem:[#allocation9 + $0x8] sm:$0xff]  ;;  %v1140_v53 = vld [vmem:[%s1878_s6] sm:$0xff] }
  0xf4   :  { %v1804_v13 = vadd.f32 %v1006_v34, %v1761_v45  ;;  %v1807_v48 = vadd.f32 %v1007_v12, %v1763_v11  ;;  %v1108_v22 = vadd.f32 %v1092_v20, %v1059_v61  ;;  %v1109_v15 = vadd.f32 %v1093_v39, %v1060_v14  ;;  %v1083_v12 = vld [vmem:[#allocation6 + $0x7b8] sm:$0xff]  ;;  %v1084_v61 = vld [vmem:[#allocation6 + $0x7c0] sm:$0xff] }
  0xf5   :  { %v1810_v58 = vadd.f32 %v1008_v63, %v1765_v8  ;;  %v1049_v9 = vmul.f32 %v1033_v21, %v1890_v19  ;;  %v1063_v57 = vadd.f32 %v1047_v62, %v1014_v40  ;;  %v1096_v50 = vmul.f32 %v1080_v17, %v1891_v38  ;;  %v1041_v8 = vld [vmem:[#allocation6 + $0x770] sm:$0xff]  ;;  %v1142_v63 = vld [vmem:[#allocation9] sm:$0xff]  ;;  %v1141_v21 = vld [vmem:[%s1878_s6 + $0x8] sm:$0xff] }
  0xf6   :  { %v1815_v45 = vadd.f32 %v1009_v59, %v1767_v16  ;;  %v1050_v11 = vmul.f32 %v1034_v28, %v1890_v19  ;;  %v1051_v7 = vmul.f32 %v1035_v42, %v1890_v19  ;;  %v1110_v51 = vadd.f32 %v1094_v37, %v1061_v24  ;;  %v1149_v40 = vld [vmem:[#allocation9 + $0x10] sm:$0xff]  ;;  %v1156_v24 = vld [vmem:[#allocation9 + $0x20] sm:$0xff]  ;;  %v1157_v17 = vld [vmem:[#allocation9 + $0x28] sm:$0xff] }
  0xf7   :  { %v1052_v41 = vmul.f32 %v1036_v35, %v1890_v19  ;;  %v1064_v18 = vadd.f32 %v1048_v6, %v1015_v4  ;;  %v1097_v32 = vmul.f32 %v1081_v31, %v1891_v38  ;;  %v1111_v10 = vadd.f32 %v1095_v49, %v1062_v27  ;;  %v1150_v4 = vld [vmem:[#allocation9 + $0x18] sm:$0xff]  ;;  %v1085_v37 = vld [vmem:[#allocation6 + $0x7c8] sm:$0xff]  ;;  %v1163_v31 = vld [vmem:[#allocation9 + $0x30] sm:$0xff] }
  0xf8   :  { %v1053_v34 = vmul.f32 %v1037_v25, %v1890_v19  ;;  %v1823_v16 = vmul.f32 %v1038_v36, %v1890_v19  ;;  %v1124_v23 = vmax.f32 %v1108_v22, 0.0  ;;  %v1125_v54 = vmax.f32 %v1109_v15, 0.0  ;;  %v1164_v22 = vld [vmem:[#allocation9 + $0x38] sm:$0xff]  ;;  %v1086_v15 = vld [vmem:[#allocation6 + $0x7d0] sm:$0xff] }
  0xf9   :  { %v1826_v59 = vmul.f32 %v1039_v1, %v1890_v19  ;;  %v1065_v5 = vadd.f32 %v1049_v9, %v1016_v60  ;;  %v1098_v2 = vmul.f32 %v1082_v43, %v1891_v38  ;;  %v1112_v52 = vadd.f32 %v1096_v50, %v1063_v57 }
  0xfa   :  { %v1830_v26 = vmul.f32 %v1040_v29, %v1890_v19  ;;  %v1833_v44 = vmul.f32 %v1041_v8, %v1890_v19  ;;  %v1836_v46 = vmul.f32 %v1042_v47, %v1890_v19  ;;  %v1126_v14 = vmax.f32 %v1110_v51, 0.0  ;;  %v1170_v51 = vld [vmem:[#allocation9 + $0x40] sm:$0xff]  ;;  %v1171_v29 = vld [vmem:[#allocation9 + $0x48] sm:$0xff] }
  0xfb   :  { %v1066_v20 = vadd.f32 %v1050_v11, %v1017_v56  ;;  %v1099_v39 = vmul.f32 %v1083_v12, %v1891_v38  ;;  %v1113_v60 = vadd.f32 %v1097_v32, %v1064_v18  ;;  %v1127_v62 = vmax.f32 %v1111_v10, 0.0 }
  0xfc   :  { %v1144_v19 = vmul.f32 %v1142_v63, %v1124_v23  ;;  %v1145_v28 = vmul.f32 %v1143_v55, %v1124_v23  ;;  %v1151_v42 = vmul.f32 %v1149_v40, %v1125_v54  ;;  %v1152_v6 = vmul.f32 %v1150_v4, %v1125_v54  ;;  %v1177_v54 = vld [vmem:[#allocation9 + $0x50] sm:$0xff]  ;;  %v1178_v63 = vld [vmem:[#allocation9 + $0x58] sm:$0xff] }
  0xfd   :  { %v1067_v27 = vadd.f32 %v1051_v7, %v1789_v30  ;;  %v1100_v49 = vmul.f32 %v1084_v61, %v1891_v38  ;;  %v1114_v56 = vadd.f32 %v1098_v2, %v1065_v5  ;;  %v1128_v35 = vmax.f32 %v1112_v52, 0.0  ;;  %v1087_v30 = vld [vmem:[#allocation6 + $0x7d8] sm:$0xff] }
  0xfe   :  { %v1146_v25 = vadd.f32 %v1144_v19, %v1140_v53  ;;  %v1147_v36 = vadd.f32 %v1145_v28, %v1141_v21  ;;  %v1158_v9 = vmul.f32 %v1156_v24, %v1126_v14  ;;  %v1159_v57 = vmul.f32 %v1157_v17, %v1126_v14  ;;  %v1184_v14 = vld [vmem:[#allocation9 + $0x60] sm:$0xff] }
  0xff   :  { %v1068_v50 = vadd.f32 %v1052_v41, %v1793_v33  ;;  %v1101_v1 = vmul.f32 %v1085_v37, %v1891_v38  ;;  %v1115_v11 = vadd.f32 %v1099_v39, %v1066_v20  ;;  %v1129_v43 = vmax.f32 %v1113_v60, 0.0  ;;  %v1088_v33 = vld [vmem:[#allocation6 + $0x7e0] sm:$0xff]  ;;  %v1191_v37 = vld [vmem:[#allocation9 + $0x70] sm:$0xff] }
 0x100   :  { %v1153_v7 = vadd.f32 %v1151_v42, %v1146_v25  ;;  %v1154_v8 = vadd.f32 %v1152_v6, %v1147_v36  ;;  %v1165_v47 = vmul.f32 %v1163_v31, %v1127_v62  ;;  %v1166_v18 = vmul.f32 %v1164_v22, %v1127_v62  ;;  %v1198_v31 = vld [vmem:[#allocation9 + $0x80] sm:$0xff] }
 0x101   :  { %v1069_v32 = vadd.f32 %v1053_v34, %v1795_v3  ;;  %v1102_v10 = vmul.f32 %v1086_v15, %v1891_v38  ;;  %v1116_v12 = vadd.f32 %v1100_v49, %v1067_v27  ;;  %v1130_v23 = vmax.f32 %v1114_v56, 0.0  ;;  %v1185_v3 = vld [vmem:[#allocation9 + $0x68] sm:$0xff] }
 0x102   :  { %v1160_v41 = vadd.f32 %v1158_v9, %v1153_v7  ;;  %v1161_v5 = vadd.f32 %v1159_v57, %v1154_v8  ;;  %v1172_v2 = vmul.f32 %v1170_v51, %v1128_v35  ;;  %v1173_v52 = vmul.f32 %v1171_v29, %v1128_v35  ;;  %v1089_v34 = vld [vmem:[#allocation6 + $0x7e8] sm:$0xff] }
 0x103   :  { %v1070_v55 = vadd.f32 %v1823_v16, %v1799_v0  ;;  %v1103_v40 = vmul.f32 %v1087_v30, %v1891_v38  ;;  %v1117_v4 = vadd.f32 %v1101_v1, %v1068_v50  ;;  %v1131_v61 = vmax.f32 %v1115_v11, 0.0  ;;  %v1192_v0 = vld [vmem:[#allocation9 + $0x78] sm:$0xff]  ;;  %v1090_v16 = vld [vmem:[#allocation6 + $0x7f0] sm:$0xff] }
 0x104   :  { %v1167_v53 = vadd.f32 %v1165_v47, %v1160_v41  ;;  %v1168_v20 = vadd.f32 %v1166_v18, %v1161_v5  ;;  %v1179_v39 = vmul.f32 %v1177_v54, %v1129_v43  ;;  %v1180_v60 = vmul.f32 %v1178_v63, %v1129_v43  ;;  %v1205_v11 = vld [vmem:[#allocation9 + $0x90] sm:$0xff]  ;;  %v1212_v18 = vld [vmem:[#allocation9 + $0xa0] sm:$0xff] }
 0x105   :  { %v1071_v62 = vadd.f32 %v1826_v59, %v1804_v13  ;;  %v1104_v21 = vmul.f32 %v1088_v33, %v1891_v38  ;;  %v1118_v24 = vadd.f32 %v1102_v10, %v1069_v32  ;;  %v1132_v17 = vmax.f32 %v1116_v12, 0.0  ;;  %v1199_v13 = vld [vmem:[#allocation9 + $0x88] sm:$0xff]  ;;  %v1091_v59 = vld [vmem:[#allocation6 + $0x7f8] sm:$0xff]  ;;  %v1219_v63 = vld [vmem:[#allocation9 + $0xb0] sm:$0xff] }
 0x106   :  { %v1174_v19 = vadd.f32 %v1172_v2, %v1167_v53  ;;  %v1175_v28 = vadd.f32 %v1173_v52, %v1168_v20  ;;  %v1186_v42 = vmul.f32 %v1184_v14, %v1130_v23  ;;  %v1187_v6 = vmul.f32 %v1185_v3, %v1130_v23  ;;  %v1213_v32 = vld [vmem:[#allocation9 + $0xa8] sm:$0xff]  ;;  %v1220_v33 = vld [vmem:[#allocation9 + $0xb8] sm:$0xff] }
 0x107   :  { %v1072_v27 = vadd.f32 %v1830_v26, %v1807_v48  ;;  %v1105_v49 = vmul.f32 %v1089_v34, %v1891_v38  ;;  %v1119_v56 = vadd.f32 %v1103_v40, %v1070_v55  ;;  %v1133_v35 = vmax.f32 %v1117_v4, 0.0  ;;  %v1206_v48 = vld [vmem:[#allocation9 + $0x98] sm:$0xff]  ;;  %v1233_v34 = vld [vmem:[#allocation9 + $0xd0] sm:$0xff] }
 0x108   :  { %v1181_v22 = vadd.f32 %v1179_v39, %v1174_v19  ;;  %v1182_v15 = vadd.f32 %v1180_v60, %v1175_v28  ;;  %v1193_v25 = vmul.f32 %v1191_v37, %v1131_v61  ;;  %v1194_v36 = vmul.f32 %v1192_v0, %v1131_v61  ;;  %v1234_v53 = vld [vmem:[#allocation9 + $0xd8] sm:$0xff]  ;;  %v1247_v28 = vld [vmem:[#allocation9 + $0xf0] sm:$0xff] }
 0x109   :  { %v1073_v9 = vadd.f32 %v1833_v44, %v1810_v58  ;;  %v1106_v57 = vmul.f32 %v1090_v16, %v1891_v38  ;;  %v1120_v50 = vadd.f32 %v1104_v21, %v1071_v62  ;;  %v1134_v1 = vmax.f32 %v1118_v24, 0.0  ;;  %v1240_v24 = vld [vmem:[#allocation9 + $0xe0] sm:$0xff] }
 0x10a   :  { %v1188_v26 = vadd.f32 %v1186_v42, %v1181_v22  ;;  %v1189_v43 = vadd.f32 %v1187_v6, %v1182_v15  ;;  %v1200_v51 = vmul.f32 %v1198_v31, %v1132_v17  ;;  %v1201_v29 = vmul.f32 %v1199_v13, %v1132_v17  ;;  %v1241_v17 = vld [vmem:[#allocation9 + $0xe8] sm:$0xff]  ;;  %v1248_v42 = vld [vmem:[#allocation9 + $0xf8] sm:$0xff] }
 0x10b   :  { %v1074_v30 = vadd.f32 %v1836_v46, %v1815_v45  ;;  %v1107_v7 = vmul.f32 %v1091_v59, %v1891_v38  ;;  %v1121_v8 = vadd.f32 %v1105_v49, %v1072_v27  ;;  %v1135_v47 = vmax.f32 %v1119_v56, 0.0  ;;  %v1226_v46 = vld [vmem:[#allocation9 + $0xc0] sm:$0xff]  ;;  %v1227_v38 = vld [vmem:[#allocation9 + $0xc8] sm:$0xff] }
 0x10c   :  { %v1195_v58 = vadd.f32 %v1193_v25, %v1188_v26  ;;  %v1196_v44 = vadd.f32 %v1194_v36, %v1189_v43  ;;  %v1207_v10 = vmul.f32 %v1205_v11, %v1133_v35  ;;  %v1208_v12 = vmul.f32 %v1206_v48, %v1133_v35 }
 0x10d   :  { %v1122_v23 = vadd.f32 %v1106_v57, %v1073_v9  ;;  %v1136_v54 = vmax.f32 %v1120_v50, 0.0  ;;  %v1214_v2 = vmul.f32 %v1212_v18, %v1134_v1  ;;  %v1215_v52 = vmul.f32 %v1213_v32, %v1134_v1 }
 0x10e   :  { %v1202_v41 = vadd.f32 %v1200_v51, %v1195_v58  ;;  %v1203_v5 = vadd.f32 %v1201_v29, %v1196_v44  ;;  %v1123_v55 = vadd.f32 %v1107_v7, %v1074_v30  ;;  %v1137_v45 = vmax.f32 %v1121_v8, 0.0 }
 0x10f   :  { %v1221_v61 = vmul.f32 %v1219_v63, %v1135_v47  ;;  %v1222_v14 = vmul.f32 %v1220_v33, %v1135_v47  ;;  %v1138_v3 = vmax.f32 %v1122_v23, 0.0  ;;  %v1228_v60 = vmul.f32 %v1226_v46, %v1136_v54 }
 0x110   :  { %v1209_v40 = vadd.f32 %v1207_v10, %v1202_v41  ;;  %v1210_v4 = vadd.f32 %v1208_v12, %v1203_v5  ;;  %v1229_v62 = vmul.f32 %v1227_v38, %v1136_v54  ;;  %v1139_v21 = vmax.f32 %v1123_v55, 0.0 }
 0x111   :  { %v1235_v16 = vmul.f32 %v1233_v34, %v1137_v45  ;;  %v1236_v19 = vmul.f32 %v1234_v53, %v1137_v45  ;;  %v1242_v49 = vmul.f32 %v1240_v24, %v1138_v3  ;;  %v1243_v56 = vmul.f32 %v1241_v17, %v1138_v3 }
 0x112   :  { %v1216_v20 = vadd.f32 %v1214_v2, %v1209_v40  ;;  %v1217_v39 = vadd.f32 %v1215_v52, %v1210_v4  ;;  %v1249_v13 = vmul.f32 %v1247_v28, %v1139_v21  ;;  %v1250_v59 = vmul.f32 %v1248_v42, %v1139_v21 }
 0x114   :  { %v1223_v37 = vadd.f32 %v1221_v61, %v1216_v20  ;;  %v1224_v0 = vadd.f32 %v1222_v14, %v1217_v39 }
 0x116   :  { %v1230_v6 = vadd.f32 %v1228_v60, %v1223_v37  ;;  %v1231_v27 = vadd.f32 %v1229_v62, %v1224_v0 }
 0x118   :  { %v1237_v35 = vadd.f32 %v1235_v16, %v1230_v6  ;;  %v1238_v31 = vadd.f32 %v1236_v19, %v1231_v27 }
 0x11a   :  { %v1244_v22 = vadd.f32 %v1242_v49, %v1237_v35  ;;  %v1245_v15 = vadd.f32 %v1243_v56, %v1238_v31 }
 0x11c   :  { %v1251_v25 = vadd.f32 %v1249_v13, %v1244_v22  ;;  %v1252_v36 = vadd.f32 %v1250_v59, %v1245_v15 }
 0x11e   :  { %1253 = vst [vmem:[%s1879_s7] sm:$0xff] %v1251_v25  ;;  %1254 = vst [vmem:[%s1879_s7 + $0x8] sm:$0xff] %v1252_v36 }
 0x11f   :  { %1259 = vsyncpa [#allocation3], 1 }
 0x120   :  { %1260 = vsyncpa [#allocation5], 1 }
 0x121   :  { %1261 = vsyncpa [#allocation8], 1 }

</bundles_post_ra>
